<compile_context>
chip_gen: v5e
topology: v5e:2x2
jax: 0.10.0
libtpu: 0.0.40
codegen_flags: <defaults>
</compile_context>

<pallas_src>
import functools
import math

import jax
import jax.numpy as jnp
from jax import lax
from jax.experimental import pallas as pl
from jax.experimental.pallas import tpu as pltpu


def mha_kernel(x_ref, wqkv_ref, bqkv_ref, wp_ref, bp_ref, o_ref, concat_ref,
               *, n_head, head_size, bblk, seq_len, softmax_bf16, approx_recip):
    """One block of `bblk` batch elements: fused QKV -> per-head attention -> proj."""
    mm_dtype = wqkv_ref.dtype            # bf16 on the fast path, f32 otherwise
    hs = head_size
    hsum = n_head * head_size
    T = seq_len
    C = x_ref.shape[-1]

    # (bblk, T, C) -> (bblk*T, C): free merge of leading (sublane) dims; gives the
    # MXU a tall M for both projection matmuls even when T is short.
    x = x_ref[...].reshape(bblk * T, C)

    # Fused Q/K/V projection: one wide MXU matmul, f32 accumulation, f32 bias add.
    # The softmax 1/sqrt(hs) scale is already folded into the Q columns of wqkv/bqkv.
    qkv = jnp.dot(x, wqkv_ref[...],
                  preferred_element_type=jnp.float32) + bqkv_ref[...]

    for b in range(bblk):                 # static unroll; bblk and n_head are small
        r0 = b * T
        for h in range(n_head):
            qh = qkv[r0:r0 + T, h * hs:(h + 1) * hs].astype(mm_dtype)
            kh = qkv[r0:r0 + T, hsum + h * hs:hsum + (h + 1) * hs].astype(mm_dtype)
            vh = qkv[r0:r0 + T,
                     2 * hsum + h * hs:2 * hsum + (h + 1) * hs].astype(mm_dtype)

            # Q @ K^T without materializing K^T: contract both last dims directly.
            s = lax.dot_general(qh, kh, (((1,), (1,)), ((), ())),
                                preferred_element_type=jnp.float32)
            s = s - jnp.max(s, axis=-1, keepdims=True)     # stable softmax
            if softmax_bf16:
                # v6e/v7x: bf16 EUP exp (~2x throughput); inputs <= 0 and p is
                # consumed by a bf16 matmul anyway.
                p = jnp.exp(s.astype(jnp.bfloat16))
            else:
                p = jnp.exp(s)                              # v5e: f32-only EUP/VPU

            # Deferred normalization: f32 row-sum, normalize the (T, hs) head
            # output after the PV matmul instead of the (T, T) probabilities.
            denom = jnp.sum(p.astype(jnp.float32), axis=-1, keepdims=True)
            o_h = jnp.dot(p.astype(mm_dtype), vh,
                          preferred_element_type=jnp.float32)
            o_h = o_h * pl.reciprocal(denom, approx=approx_recip)

            # eval-mode dropout on the attention probabilities == identity.
            concat_ref[r0:r0 + T, h * hs:(h + 1) * hs] = o_h.astype(mm_dtype)

    # Output projection on the whole (bblk*T, hsum) slab: one wide MXU matmul.
    out = jnp.dot(concat_ref[...], wp_ref[...],
                  preferred_element_type=jnp.float32) + bp_ref[...]
    # eval-mode dropout on the projected output == identity.
    o_ref[...] = out.reshape(bblk, T, out.shape[-1]).astype(o_ref.dtype)


def _nbytes(a):
    return int(a.size) * a.dtype.itemsize


def _vmem_limit_bytes():
    """~75% of physical VMEM: ~96 MiB on v5e/v6e (128 MiB), ~48 MiB on v7x (64 MiB)."""
    cap = None
    try:
        cap = getattr(pltpu.get_tpu_info(), "vmem_capacity_bytes", None)
    except Exception:
        cap = None
    if not cap:
        cap = 64 * 1024 * 1024            # conservative (v7x-sized) fallback
    return int(cap) * 3 // 4


def _supports_bf16_eup():
    """bf16 transcendentals only on v6e / v7x; v5e (and older) keep f32 softmax."""
    try:
        kind = jax.devices()[0].device_kind.lower()
    except Exception:
        return False
    return ("v6" in kind) or ("v7" in kind)


def _pick_bblk(B, T, C, hsum, d_out, vmem_budget):
    """Batch-block so each grid step has >= ~256 matmul rows, within VMEM budget."""
    target = max(1, -(-256 // T))                      # ceil(256 / T)
    # Rough per-row VMEM bytes for the blocked slabs (x, qkv, concat, out),
    # x2 for double buffering; keep 2/3 of the budget as slack for score tiles etc.
    per_row = (C * 2 + 3 * hsum * 4 + hsum * 2 + d_out * 4) * 2
    cap = max(1, (vmem_budget // 3) // max(1, per_row * T))
    bblk = max(1, min(B, target, cap))
    while B % bblk:                                     # need an exact divisor of B
        bblk -= 1
    return bblk


def multi_unmasked(x, wq, bq, wk, bk, wv, bv, wp, bp, *, use_bf16=True):
    """MultiUnMasked forward (eval mode).

    x        : (B, T, C)
    wq/wk/wv : (n_head, head_size, C)   -- per-head PyTorch Linear weights
    bq/bk/bv : (n_head, head_size)
    wp       : (d_out, n_head*head_size), bp: (d_out,)
    returns  : (B, T, d_out)
    """
    B, T, C = x.shape
    n_head, head_size, _ = wq.shape
    hsum = n_head * head_size
    d_out = wp.shape[0]
    scale = 1.0 / math.sqrt(head_size)

    # (H, hs, C) -> (C, H*hs): per-head W^T, heads concatenated along the out axis.
    def fuse(w):
        return jnp.transpose(w, (2, 0, 1)).reshape(C, hsum)

    # Fold the softmax scale into the Q projection (weights AND bias): a one-time
    # wrapper transform replaces a per-step (T, T) VALU multiply in the kernel.
    wqkv = jnp.concatenate([fuse(wq) * scale, fuse(wk), fuse(wv)], axis=1)
    bqkv = jnp.concatenate([bq.reshape(-1) * scale, bk.reshape(-1),
                            bv.reshape(-1)]).reshape(1, 3 * hsum)
    wp_io = wp.T                                                   # (H*hs, d_out)
    bp2 = bp.reshape(1, d_out)

    mm_dtype = jnp.bfloat16 if use_bf16 else x.dtype
    x_c = x.astype(mm_dtype)
    wqkv_c = wqkv.astype(mm_dtype)
    wp_c = wp_io.astype(mm_dtype)

    vmem_limit = _vmem_limit_bytes()
    bblk = _pick_bblk(B, T, C, hsum, d_out, vmem_limit)
    softmax_bf16 = use_bf16 and _supports_bf16_eup()

    flops = (2 * B * T * C * 3 * hsum                     # fused QKV projection
             + 2 * B * n_head * T * T * head_size * 2     # QK^T and PV matmuls
             + 2 * B * T * hsum * d_out)                  # output projection
    bytes_accessed = (_nbytes(x_c) + _nbytes(wqkv_c) + _nbytes(bqkv)
                      + _nbytes(wp_c) + _nbytes(bp2)
                      + B * T * d_out * x.dtype.itemsize)

    kernel = functools.partial(
        mha_kernel, n_head=n_head, head_size=head_size, bblk=bblk, seq_len=T,
        softmax_bf16=softmax_bf16, approx_recip=use_bf16)

    out = pl.pallas_call(
        kernel,
        out_shape=jax.ShapeDtypeStruct((B, T, d_out), x.dtype),
        grid_spec=pltpu.PrefetchScalarGridSpec(
            num_scalar_prefetch=0,
            grid=(B // bblk,),
            in_specs=[
                pl.BlockSpec((bblk, T, C), lambda b: (b, 0, 0)),     # x slab
                # Constant index_maps: weights/biases DMA'd once, VMEM-resident.
                pl.BlockSpec((C, 3 * hsum), lambda b: (0, 0)),       # fused Wqkv
                pl.BlockSpec((1, 3 * hsum), lambda b: (0, 0)),       # fused bqkv (f32)
                pl.BlockSpec((hsum, d_out), lambda b: (0, 0)),       # Wproj
                pl.BlockSpec((1, d_out), lambda b: (0, 0)),          # bproj (f32)
            ],
            out_specs=pl.BlockSpec((bblk, T, d_out), lambda b: (b, 0, 0)),
            scratch_shapes=[pltpu.VMEM((bblk * T, hsum), mm_dtype)],  # head-out slab
        ),
        compiler_params=pltpu.CompilerParams(
            dimension_semantics=("parallel",),        # megacore split on v7x
            vmem_limit_bytes=vmem_limit,              # per-generation budget
        ),
        cost_estimate=pl.CostEstimate(
            flops=int(flops),
            transcendentals=int(B * n_head * T * T),
            bytes_accessed=int(bytes_accessed)),
    )(x_c, wqkv_c, bqkv, wp_c, bp2)

    return out


def reference(x, wq, bq, wk, bk, wv, bv, wp, bp):
    """Pure-JAX f32 reference (eval-mode dropout == identity)."""
    hp = jax.lax.Precision.HIGHEST
    n_head, head_size, _ = wq.shape
    outs = []
    for h in range(n_head):
        q = jnp.einsum('btc,dc->btd', x, wq[h], precision=hp) + bq[h]
        k = jnp.einsum('btc,dc->btd', x, wk[h], precision=hp) + bk[h]
        v = jnp.einsum('btc,dc->btd', x, wv[h], precision=hp) + bv[h]
        s = jnp.einsum('bqd,bkd->bqk', q, k, precision=hp) * (head_size ** -0.5)
        p = jax.nn.softmax(s, axis=-1)
        outs.append(jnp.einsum('bqk,bkd->bqd', p, v, precision=hp))
    cat = jnp.concatenate(outs, axis=-1)
    return jnp.einsum('btd,od->bto', cat, wp, precision=hp) + bp


if __name__ == "__main__":
    # Small shapes consistent with the module: (batch, seq, d_model), n_head heads.
    batch, seq, d_model_s, n_head_s = 2, 16, 32, 4
    head_size = d_model_s // n_head_s            # 8
    hsum = n_head_s * head_size

    key = jax.random.PRNGKey(0)
    kx, kq, kbq, kk, kbk, kv, kbv, kp, kbp = jax.random.split(key, 9)

    x = jax.random.normal(kx, (batch, seq, d_model_s), dtype=jnp.float32)
    bnd_in = 1.0 / math.sqrt(d_model_s)          # ~ PyTorch Linear init bounds
    bnd_pr = 1.0 / math.sqrt(hsum)
    wq = jax.random.uniform(kq, (n_head_s, head_size, d_model_s), jnp.float32, -bnd_in, bnd_in)
    bq = jax.random.uniform(kbq, (n_head_s, head_size), jnp.float32, -bnd_in, bnd_in)
    wk = jax.random.uniform(kk, (n_head_s, head_size, d_model_s), jnp.float32, -bnd_in, bnd_in)
    bk = jax.random.uniform(kbk, (n_head_s, head_size), jnp.float32, -bnd_in, bnd_in)
    wv = jax.random.uniform(kv, (n_head_s, head_size, d_model_s), jnp.float32, -bnd_in, bnd_in)
    bv = jax.random.uniform(kbv, (n_head_s, head_size), jnp.float32, -bnd_in, bnd_in)
    wp = jax.random.uniform(kp, (d_model_s, hsum), jnp.float32, -bnd_pr, bnd_pr)
    bp = jax.random.uniform(kbp, (d_model_s,), jnp.float32, -bnd_pr, bnd_pr)

    ref = reference(x, wq, bq, wk, bk, wv, bv, wp, bp)

    # f32 path: tight check (exact reciprocal, f32 softmax; MXU default precision).
    out_f32 = jax.block_until_ready(
        multi_unmasked(x, wq, bq, wk, bk, wv, bv, wp, bp, use_bf16=False))
    assert out_f32.shape == (batch, seq, d_model_s)
    assert jnp.allclose(out_f32, ref, atol=5e-4, rtol=5e-4)

    # Default fast path: bf16 matmul operands + (on v6e/v7x) bf16 exp and approx
    # reciprocal, f32 accumulation throughout (looser check).
    out_bf16 = jax.block_until_ready(
        multi_unmasked(x, wq, bq, wk, bk, wv, bv, wp, bp, use_bf16=True))
    assert out_bf16.shape == (batch, seq, d_model_s)
    assert jnp.allclose(out_bf16, ref, atol=3e-2, rtol=3e-2)

    print("KERNEL_OK")
</pallas_src>

<mosaic_0001>
module attributes {stable_mosaic.version = 11 : i64} {
  func.func @mha_kernel(%arg0: i32, %arg1: memref<2x16x32xf32, #tpu.memory_space<vmem>>, %arg2: memref<32x96xf32, #tpu.memory_space<vmem>>, %arg3: memref<1x96xf32, #tpu.memory_space<vmem>>, %arg4: memref<32x32xf32, #tpu.memory_space<vmem>>, %arg5: memref<1x32xf32, #tpu.memory_space<vmem>>, %arg6: memref<2x16x32xf32, #tpu.memory_space<vmem>>, %arg7: memref<32x32xf32, #tpu.memory_space<vmem>>) attributes {dimension_semantics = [#tpu.dimension_semantics<parallel>], iteration_bounds = array<i64: 1>, scalar_prefetch = 0 : i64, scratch_operands = 1 : i64, tpu.core_type = #tpu.core_type<tc>, window_params = [{transform_indices = @transform_0, window_bounds = array<i64: 2, 16, 32>}, {pipeline_mode = #tpu.pipeline_mode<synchronous>, transform_indices = @transform_1, window_bounds = array<i64: 32, 96>}, {pipeline_mode = #tpu.pipeline_mode<synchronous>, transform_indices = @transform_2, window_bounds = array<i64: 1, 96>}, {pipeline_mode = #tpu.pipeline_mode<synchronous>, transform_indices = @transform_3, window_bounds = array<i64: 32, 32>}, {pipeline_mode = #tpu.pipeline_mode<synchronous>, transform_indices = @transform_4, window_bounds = array<i64: 1, 32>}, {transform_indices = @transform_5, window_bounds = array<i64: 2, 16, 32>}]} {
    %c0 = arith.constant 0 : index
    %c0_0 = arith.constant 0 : index
    %c0_1 = arith.constant 0 : index
    %0 = vector.load %arg1[%c0, %c0_0, %c0_1] : memref<2x16x32xf32, #tpu.memory_space<vmem>>, vector<2x16x32xf32>
    %1 = vector.shape_cast %0 : vector<2x16x32xf32> to vector<32x32xf32>
    %c0_2 = arith.constant 0 : index
    %c0_3 = arith.constant 0 : index
    %2 = vector.load %arg2[%c0_2, %c0_3] : memref<32x96xf32, #tpu.memory_space<vmem>>, vector<32x96xf32>
    %cst = arith.constant dense<0.000000e+00> : vector<32x96xf32>
    %3 = tpu.matmul %1, %2, %cst {dimension_numbers = #tpu.dot_dimension_numbers<[1], [0], [0], [1], [0, 0, 1, 1], [], []>} : vector<32x32xf32>, vector<32x96xf32>, vector<32x96xf32> -> vector<32x96xf32>
    %c0_4 = arith.constant 0 : index
    %c0_5 = arith.constant 0 : index
    %4 = vector.load %arg3[%c0_4, %c0_5] : memref<1x96xf32, #tpu.memory_space<vmem>>, vector<1x96xf32>
    %5 = vector.broadcast %4 : vector<1x96xf32> to vector<32x96xf32>
    %6 = arith.addf %3, %5 : vector<32x96xf32>
    %7 = vector.extract_strided_slice %6 {offsets = [0, 0], sizes = [16, 8], strides = [1, 1]} : vector<32x96xf32> to vector<16x8xf32>
    %8 = vector.extract_strided_slice %6 {offsets = [0, 32], sizes = [16, 8], strides = [1, 1]} : vector<32x96xf32> to vector<16x8xf32>
    %9 = vector.extract_strided_slice %6 {offsets = [0, 64], sizes = [16, 8], strides = [1, 1]} : vector<32x96xf32> to vector<16x8xf32>
    %cst_6 = arith.constant dense<0.000000e+00> : vector<16x16xf32>
    %10 = tpu.matmul %7, %8, %cst_6 {dimension_numbers = #tpu.dot_dimension_numbers<[1], [1], [0], [0], [0, 0, 1, 0], [], []>} : vector<16x8xf32>, vector<16x8xf32>, vector<16x16xf32> -> vector<16x16xf32>
    %cst_7 = arith.constant dense<0xFF800000> : vector<16xf32>
    %11 = vector.multi_reduction <maximumf>, %10, %cst_7 [1] : vector<16x16xf32> to vector<16xf32>
    %12 = vector.shape_cast %11 : vector<16xf32> to vector<16x1xf32>
    %13 = vector.broadcast %12 : vector<16x1xf32> to vector<16x16xf32>
    %14 = arith.subf %10, %13 : vector<16x16xf32>
    %15 = math.exp %14 : vector<16x16xf32>
    %cst_8 = arith.constant dense<0.000000e+00> : vector<16xf32>
    %16 = vector.multi_reduction <add>, %15, %cst_8 [1] : vector<16x16xf32> to vector<16xf32>
    %17 = vector.shape_cast %16 : vector<16xf32> to vector<16x1xf32>
    %cst_9 = arith.constant dense<0.000000e+00> : vector<16x8xf32>
    %18 = tpu.matmul %15, %9, %cst_9 {dimension_numbers = #tpu.dot_dimension_numbers<[1], [0], [0], [1], [0, 0, 1, 1], [], []>} : vector<16x16xf32>, vector<16x8xf32>, vector<16x8xf32> -> vector<16x8xf32>
    %19 = tpu.reciprocal %17 : vector<16x1xf32> -> vector<16x1xf32>
    %20 = vector.broadcast %19 : vector<16x1xf32> to vector<16x8xf32>
    %21 = arith.mulf %18, %20 : vector<16x8xf32>
    %c0_10 = arith.constant 0 : index
    %c0_11 = arith.constant 0 : index
    %22 = vector.load %arg7[%c0_10, %c0_11] : memref<32x32xf32, #tpu.memory_space<vmem>>, vector<16x8xf32>
    tpu.vector_store %arg7[%c0_10, %c0_11], %21 {strides = array<i32>} : memref<32x32xf32, #tpu.memory_space<vmem>>, vector<16x8xf32>,
    %23 = vector.extract_strided_slice %6 {offsets = [0, 8], sizes = [16, 8], strides = [1, 1]} : vector<32x96xf32> to vector<16x8xf32>
    %24 = vector.extract_strided_slice %6 {offsets = [0, 40], sizes = [16, 8], strides = [1, 1]} : vector<32x96xf32> to vector<16x8xf32>
    %25 = vector.extract_strided_slice %6 {offsets = [0, 72], sizes = [16, 8], strides = [1, 1]} : vector<32x96xf32> to vector<16x8xf32>
    %cst_12 = arith.constant dense<0.000000e+00> : vector<16x16xf32>
    %26 = tpu.matmul %23, %24, %cst_12 {dimension_numbers = #tpu.dot_dimension_numbers<[1], [1], [0], [0], [0, 0, 1, 0], [], []>} : vector<16x8xf32>, vector<16x8xf32>, vector<16x16xf32> -> vector<16x16xf32>
    %cst_13 = arith.constant dense<0xFF800000> : vector<16xf32>
    %27 = vector.multi_reduction <maximumf>, %26, %cst_13 [1] : vector<16x16xf32> to vector<16xf32>
    %28 = vector.shape_cast %27 : vector<16xf32> to vector<16x1xf32>
    %29 = vector.broadcast %28 : vector<16x1xf32> to vector<16x16xf32>
    %30 = arith.subf %26, %29 : vector<16x16xf32>
    %31 = math.exp %30 : vector<16x16xf32>
    %cst_14 = arith.constant dense<0.000000e+00> : vector<16xf32>
    %32 = vector.multi_reduction <add>, %31, %cst_14 [1] : vector<16x16xf32> to vector<16xf32>
    %33 = vector.shape_cast %32 : vector<16xf32> to vector<16x1xf32>
    %cst_15 = arith.constant dense<0.000000e+00> : vector<16x8xf32>
    %34 = tpu.matmul %31, %25, %cst_15 {dimension_numbers = #tpu.dot_dimension_numbers<[1], [0], [0], [1], [0, 0, 1, 1], [], []>} : vector<16x16xf32>, vector<16x8xf32>, vector<16x8xf32> -> vector<16x8xf32>
    %35 = tpu.reciprocal %33 : vector<16x1xf32> -> vector<16x1xf32>
    %36 = vector.broadcast %35 : vector<16x1xf32> to vector<16x8xf32>
    %37 = arith.mulf %34, %36 : vector<16x8xf32>
    %c0_16 = arith.constant 0 : index
    %c8 = arith.constant 8 : index
    %38 = vector.load %arg7[%c0_16, %c8] : memref<32x32xf32, #tpu.memory_space<vmem>>, vector<16x8xf32>
    tpu.vector_store %arg7[%c0_16, %c8], %37 {strides = array<i32>} : memref<32x32xf32, #tpu.memory_space<vmem>>, vector<16x8xf32>,
    %39 = vector.extract_strided_slice %6 {offsets = [0, 16], sizes = [16, 8], strides = [1, 1]} : vector<32x96xf32> to vector<16x8xf32>
    %40 = vector.extract_strided_slice %6 {offsets = [0, 48], sizes = [16, 8], strides = [1, 1]} : vector<32x96xf32> to vector<16x8xf32>
    %41 = vector.extract_strided_slice %6 {offsets = [0, 80], sizes = [16, 8], strides = [1, 1]} : vector<32x96xf32> to vector<16x8xf32>
    %cst_17 = arith.constant dense<0.000000e+00> : vector<16x16xf32>
    %42 = tpu.matmul %39, %40, %cst_17 {dimension_numbers = #tpu.dot_dimension_numbers<[1], [1], [0], [0], [0, 0, 1, 0], [], []>} : vector<16x8xf32>, vector<16x8xf32>, vector<16x16xf32> -> vector<16x16xf32>
    %cst_18 = arith.constant dense<0xFF800000> : vector<16xf32>
    %43 = vector.multi_reduction <maximumf>, %42, %cst_18 [1] : vector<16x16xf32> to vector<16xf32>
    %44 = vector.shape_cast %43 : vector<16xf32> to vector<16x1xf32>
    %45 = vector.broadcast %44 : vector<16x1xf32> to vector<16x16xf32>
    %46 = arith.subf %42, %45 : vector<16x16xf32>
    %47 = math.exp %46 : vector<16x16xf32>
    %cst_19 = arith.constant dense<0.000000e+00> : vector<16xf32>
    %48 = vector.multi_reduction <add>, %47, %cst_19 [1] : vector<16x16xf32> to vector<16xf32>
    %49 = vector.shape_cast %48 : vector<16xf32> to vector<16x1xf32>
    %cst_20 = arith.constant dense<0.000000e+00> : vector<16x8xf32>
    %50 = tpu.matmul %47, %41, %cst_20 {dimension_numbers = #tpu.dot_dimension_numbers<[1], [0], [0], [1], [0, 0, 1, 1], [], []>} : vector<16x16xf32>, vector<16x8xf32>, vector<16x8xf32> -> vector<16x8xf32>
    %51 = tpu.reciprocal %49 : vector<16x1xf32> -> vector<16x1xf32>
    %52 = vector.broadcast %51 : vector<16x1xf32> to vector<16x8xf32>
    %53 = arith.mulf %50, %52 : vector<16x8xf32>
    %c0_21 = arith.constant 0 : index
    %c16 = arith.constant 16 : index
    %54 = vector.load %arg7[%c0_21, %c16] : memref<32x32xf32, #tpu.memory_space<vmem>>, vector<16x8xf32>
    tpu.vector_store %arg7[%c0_21, %c16], %53 {strides = array<i32>} : memref<32x32xf32, #tpu.memory_space<vmem>>, vector<16x8xf32>,
    %55 = vector.extract_strided_slice %6 {offsets = [0, 24], sizes = [16, 8], strides = [1, 1]} : vector<32x96xf32> to vector<16x8xf32>
    %56 = vector.extract_strided_slice %6 {offsets = [0, 56], sizes = [16, 8], strides = [1, 1]} : vector<32x96xf32> to vector<16x8xf32>
    %57 = vector.extract_strided_slice %6 {offsets = [0, 88], sizes = [16, 8], strides = [1, 1]} : vector<32x96xf32> to vector<16x8xf32>
    %cst_22 = arith.constant dense<0.000000e+00> : vector<16x16xf32>
    %58 = tpu.matmul %55, %56, %cst_22 {dimension_numbers = #tpu.dot_dimension_numbers<[1], [1], [0], [0], [0, 0, 1, 0], [], []>} : vector<16x8xf32>, vector<16x8xf32>, vector<16x16xf32> -> vector<16x16xf32>
    %cst_23 = arith.constant dense<0xFF800000> : vector<16xf32>
    %59 = vector.multi_reduction <maximumf>, %58, %cst_23 [1] : vector<16x16xf32> to vector<16xf32>
    %60 = vector.shape_cast %59 : vector<16xf32> to vector<16x1xf32>
    %61 = vector.broadcast %60 : vector<16x1xf32> to vector<16x16xf32>
    %62 = arith.subf %58, %61 : vector<16x16xf32>
    %63 = math.exp %62 : vector<16x16xf32>
    %cst_24 = arith.constant dense<0.000000e+00> : vector<16xf32>
    %64 = vector.multi_reduction <add>, %63, %cst_24 [1] : vector<16x16xf32> to vector<16xf32>
    %65 = vector.shape_cast %64 : vector<16xf32> to vector<16x1xf32>
    %cst_25 = arith.constant dense<0.000000e+00> : vector<16x8xf32>
    %66 = tpu.matmul %63, %57, %cst_25 {dimension_numbers = #tpu.dot_dimension_numbers<[1], [0], [0], [1], [0, 0, 1, 1], [], []>} : vector<16x16xf32>, vector<16x8xf32>, vector<16x8xf32> -> vector<16x8xf32>
    %67 = tpu.reciprocal %65 : vector<16x1xf32> -> vector<16x1xf32>
    %68 = vector.broadcast %67 : vector<16x1xf32> to vector<16x8xf32>
    %69 = arith.mulf %66, %68 : vector<16x8xf32>
    %c0_26 = arith.constant 0 : index
    %c24 = arith.constant 24 : index
    %70 = vector.load %arg7[%c0_26, %c24] : memref<32x32xf32, #tpu.memory_space<vmem>>, vector<16x8xf32>
    tpu.vector_store %arg7[%c0_26, %c24], %69 {strides = array<i32>} : memref<32x32xf32, #tpu.memory_space<vmem>>, vector<16x8xf32>,
    %71 = vector.extract_strided_slice %6 {offsets = [16, 0], sizes = [16, 8], strides = [1, 1]} : vector<32x96xf32> to vector<16x8xf32>
    %72 = vector.extract_strided_slice %6 {offsets = [16, 32], sizes = [16, 8], strides = [1, 1]} : vector<32x96xf32> to vector<16x8xf32>
    %73 = vector.extract_strided_slice %6 {offsets = [16, 64], sizes = [16, 8], strides = [1, 1]} : vector<32x96xf32> to vector<16x8xf32>
    %cst_27 = arith.constant dense<0.000000e+00> : vector<16x16xf32>
    %74 = tpu.matmul %71, %72, %cst_27 {dimension_numbers = #tpu.dot_dimension_numbers<[1], [1], [0], [0], [0, 0, 1, 0], [], []>} : vector<16x8xf32>, vector<16x8xf32>, vector<16x16xf32> -> vector<16x16xf32>
    %cst_28 = arith.constant dense<0xFF800000> : vector<16xf32>
    %75 = vector.multi_reduction <maximumf>, %74, %cst_28 [1] : vector<16x16xf32> to vector<16xf32>
    %76 = vector.shape_cast %75 : vector<16xf32> to vector<16x1xf32>
    %77 = vector.broadcast %76 : vector<16x1xf32> to vector<16x16xf32>
    %78 = arith.subf %74, %77 : vector<16x16xf32>
    %79 = math.exp %78 : vector<16x16xf32>
    %cst_29 = arith.constant dense<0.000000e+00> : vector<16xf32>
    %80 = vector.multi_reduction <add>, %79, %cst_29 [1] : vector<16x16xf32> to vector<16xf32>
    %81 = vector.shape_cast %80 : vector<16xf32> to vector<16x1xf32>
    %cst_30 = arith.constant dense<0.000000e+00> : vector<16x8xf32>
    %82 = tpu.matmul %79, %73, %cst_30 {dimension_numbers = #tpu.dot_dimension_numbers<[1], [0], [0], [1], [0, 0, 1, 1], [], []>} : vector<16x16xf32>, vector<16x8xf32>, vector<16x8xf32> -> vector<16x8xf32>
    %83 = tpu.reciprocal %81 : vector<16x1xf32> -> vector<16x1xf32>
    %84 = vector.broadcast %83 : vector<16x1xf32> to vector<16x8xf32>
    %85 = arith.mulf %82, %84 : vector<16x8xf32>
    %c16_31 = arith.constant 16 : index
    %c0_32 = arith.constant 0 : index
    %86 = vector.load %arg7[%c16_31, %c0_32] : memref<32x32xf32, #tpu.memory_space<vmem>>, vector<16x8xf32>
    tpu.vector_store %arg7[%c16_31, %c0_32], %85 {strides = array<i32>} : memref<32x32xf32, #tpu.memory_space<vmem>>, vector<16x8xf32>,
    %87 = vector.extract_strided_slice %6 {offsets = [16, 8], sizes = [16, 8], strides = [1, 1]} : vector<32x96xf32> to vector<16x8xf32>
    %88 = vector.extract_strided_slice %6 {offsets = [16, 40], sizes = [16, 8], strides = [1, 1]} : vector<32x96xf32> to vector<16x8xf32>
    %89 = vector.extract_strided_slice %6 {offsets = [16, 72], sizes = [16, 8], strides = [1, 1]} : vector<32x96xf32> to vector<16x8xf32>
    %cst_33 = arith.constant dense<0.000000e+00> : vector<16x16xf32>
    %90 = tpu.matmul %87, %88, %cst_33 {dimension_numbers = #tpu.dot_dimension_numbers<[1], [1], [0], [0], [0, 0, 1, 0], [], []>} : vector<16x8xf32>, vector<16x8xf32>, vector<16x16xf32> -> vector<16x16xf32>
    %cst_34 = arith.constant dense<0xFF800000> : vector<16xf32>
    %91 = vector.multi_reduction <maximumf>, %90, %cst_34 [1] : vector<16x16xf32> to vector<16xf32>
    %92 = vector.shape_cast %91 : vector<16xf32> to vector<16x1xf32>
    %93 = vector.broadcast %92 : vector<16x1xf32> to vector<16x16xf32>
    %94 = arith.subf %90, %93 : vector<16x16xf32>
    %95 = math.exp %94 : vector<16x16xf32>
    %cst_35 = arith.constant dense<0.000000e+00> : vector<16xf32>
    %96 = vector.multi_reduction <add>, %95, %cst_35 [1] : vector<16x16xf32> to vector<16xf32>
    %97 = vector.shape_cast %96 : vector<16xf32> to vector<16x1xf32>
    %cst_36 = arith.constant dense<0.000000e+00> : vector<16x8xf32>
    %98 = tpu.matmul %95, %89, %cst_36 {dimension_numbers = #tpu.dot_dimension_numbers<[1], [0], [0], [1], [0, 0, 1, 1], [], []>} : vector<16x16xf32>, vector<16x8xf32>, vector<16x8xf32> -> vector<16x8xf32>
    %99 = tpu.reciprocal %97 : vector<16x1xf32> -> vector<16x1xf32>
    %100 = vector.broadcast %99 : vector<16x1xf32> to vector<16x8xf32>
    %101 = arith.mulf %98, %100 : vector<16x8xf32>
    %c16_37 = arith.constant 16 : index
    %c8_38 = arith.constant 8 : index
    %102 = vector.load %arg7[%c16_37, %c8_38] : memref<32x32xf32, #tpu.memory_space<vmem>>, vector<16x8xf32>
    tpu.vector_store %arg7[%c16_37, %c8_38], %101 {strides = array<i32>} : memref<32x32xf32, #tpu.memory_space<vmem>>, vector<16x8xf32>,
    %103 = vector.extract_strided_slice %6 {offsets = [16, 16], sizes = [16, 8], strides = [1, 1]} : vector<32x96xf32> to vector<16x8xf32>
    %104 = vector.extract_strided_slice %6 {offsets = [16, 48], sizes = [16, 8], strides = [1, 1]} : vector<32x96xf32> to vector<16x8xf32>
    %105 = vector.extract_strided_slice %6 {offsets = [16, 80], sizes = [16, 8], strides = [1, 1]} : vector<32x96xf32> to vector<16x8xf32>
    %cst_39 = arith.constant dense<0.000000e+00> : vector<16x16xf32>
    %106 = tpu.matmul %103, %104, %cst_39 {dimension_numbers = #tpu.dot_dimension_numbers<[1], [1], [0], [0], [0, 0, 1, 0], [], []>} : vector<16x8xf32>, vector<16x8xf32>, vector<16x16xf32> -> vector<16x16xf32>
    %cst_40 = arith.constant dense<0xFF800000> : vector<16xf32>
    %107 = vector.multi_reduction <maximumf>, %106, %cst_40 [1] : vector<16x16xf32> to vector<16xf32>
    %108 = vector.shape_cast %107 : vector<16xf32> to vector<16x1xf32>
    %109 = vector.broadcast %108 : vector<16x1xf32> to vector<16x16xf32>
    %110 = arith.subf %106, %109 : vector<16x16xf32>
    %111 = math.exp %110 : vector<16x16xf32>
    %cst_41 = arith.constant dense<0.000000e+00> : vector<16xf32>
    %112 = vector.multi_reduction <add>, %111, %cst_41 [1] : vector<16x16xf32> to vector<16xf32>
    %113 = vector.shape_cast %112 : vector<16xf32> to vector<16x1xf32>
    %cst_42 = arith.constant dense<0.000000e+00> : vector<16x8xf32>
    %114 = tpu.matmul %111, %105, %cst_42 {dimension_numbers = #tpu.dot_dimension_numbers<[1], [0], [0], [1], [0, 0, 1, 1], [], []>} : vector<16x16xf32>, vector<16x8xf32>, vector<16x8xf32> -> vector<16x8xf32>
    %115 = tpu.reciprocal %113 : vector<16x1xf32> -> vector<16x1xf32>
    %116 = vector.broadcast %115 : vector<16x1xf32> to vector<16x8xf32>
    %117 = arith.mulf %114, %116 : vector<16x8xf32>
    %c16_43 = arith.constant 16 : index
    %c16_44 = arith.constant 16 : index
    %118 = vector.load %arg7[%c16_43, %c16_44] : memref<32x32xf32, #tpu.memory_space<vmem>>, vector<16x8xf32>
    tpu.vector_store %arg7[%c16_43, %c16_44], %117 {strides = array<i32>} : memref<32x32xf32, #tpu.memory_space<vmem>>, vector<16x8xf32>,
    %119 = vector.extract_strided_slice %6 {offsets = [16, 24], sizes = [16, 8], strides = [1, 1]} : vector<32x96xf32> to vector<16x8xf32>
    %120 = vector.extract_strided_slice %6 {offsets = [16, 56], sizes = [16, 8], strides = [1, 1]} : vector<32x96xf32> to vector<16x8xf32>
    %121 = vector.extract_strided_slice %6 {offsets = [16, 88], sizes = [16, 8], strides = [1, 1]} : vector<32x96xf32> to vector<16x8xf32>
    %cst_45 = arith.constant dense<0.000000e+00> : vector<16x16xf32>
    %122 = tpu.matmul %119, %120, %cst_45 {dimension_numbers = #tpu.dot_dimension_numbers<[1], [1], [0], [0], [0, 0, 1, 0], [], []>} : vector<16x8xf32>, vector<16x8xf32>, vector<16x16xf32> -> vector<16x16xf32>
    %cst_46 = arith.constant dense<0xFF800000> : vector<16xf32>
    %123 = vector.multi_reduction <maximumf>, %122, %cst_46 [1] : vector<16x16xf32> to vector<16xf32>
    %124 = vector.shape_cast %123 : vector<16xf32> to vector<16x1xf32>
    %125 = vector.broadcast %124 : vector<16x1xf32> to vector<16x16xf32>
    %126 = arith.subf %122, %125 : vector<16x16xf32>
    %127 = math.exp %126 : vector<16x16xf32>
    %cst_47 = arith.constant dense<0.000000e+00> : vector<16xf32>
    %128 = vector.multi_reduction <add>, %127, %cst_47 [1] : vector<16x16xf32> to vector<16xf32>
    %129 = vector.shape_cast %128 : vector<16xf32> to vector<16x1xf32>
    %cst_48 = arith.constant dense<0.000000e+00> : vector<16x8xf32>
    %130 = tpu.matmul %127, %121, %cst_48 {dimension_numbers = #tpu.dot_dimension_numbers<[1], [0], [0], [1], [0, 0, 1, 1], [], []>} : vector<16x16xf32>, vector<16x8xf32>, vector<16x8xf32> -> vector<16x8xf32>
    %131 = tpu.reciprocal %129 : vector<16x1xf32> -> vector<16x1xf32>
    %132 = vector.broadcast %131 : vector<16x1xf32> to vector<16x8xf32>
    %133 = arith.mulf %130, %132 : vector<16x8xf32>
    %c16_49 = arith.constant 16 : index
    %c24_50 = arith.constant 24 : index
    %134 = vector.load %arg7[%c16_49, %c24_50] : memref<32x32xf32, #tpu.memory_space<vmem>>, vector<16x8xf32>
    tpu.vector_store %arg7[%c16_49, %c24_50], %133 {strides = array<i32>} : memref<32x32xf32, #tpu.memory_space<vmem>>, vector<16x8xf32>,
    %c0_51 = arith.constant 0 : index
    %c0_52 = arith.constant 0 : index
    %135 = vector.load %arg7[%c0_51, %c0_52] : memref<32x32xf32, #tpu.memory_space<vmem>>, vector<32x32xf32>
    %c0_53 = arith.constant 0 : index
    %c0_54 = arith.constant 0 : index
    %136 = vector.load %arg4[%c0_53, %c0_54] : memref<32x32xf32, #tpu.memory_space<vmem>>, vector<32x32xf32>
    %cst_55 = arith.constant dense<0.000000e+00> : vector<32x32xf32>
    %137 = tpu.matmul %135, %136, %cst_55 {dimension_numbers = #tpu.dot_dimension_numbers<[1], [0], [0], [1], [0, 0, 1, 1], [], []>} : vector<32x32xf32>, vector<32x32xf32>, vector<32x32xf32> -> vector<32x32xf32>
    %c0_56 = arith.constant 0 : index
    %c0_57 = arith.constant 0 : index
    %138 = vector.load %arg5[%c0_56, %c0_57] : memref<1x32xf32, #tpu.memory_space<vmem>>, vector<1x32xf32>
    %139 = vector.broadcast %138 : vector<1x32xf32> to vector<32x32xf32>
    %140 = arith.addf %137, %139 : vector<32x32xf32>
    %141 = vector.shape_cast %140 : vector<32x32xf32> to vector<2x16x32xf32>
    %c0_58 = arith.constant 0 : index
    %c0_59 = arith.constant 0 : index
    %c0_60 = arith.constant 0 : index
    %142 = vector.load %arg6[%c0_58, %c0_59, %c0_60] : memref<2x16x32xf32, #tpu.memory_space<vmem>>, vector<2x16x32xf32>
    tpu.vector_store %arg6[%c0_58, %c0_59, %c0_60], %141 {strides = array<i32>} : memref<2x16x32xf32, #tpu.memory_space<vmem>>, vector<2x16x32xf32>,
    return
  }
  func.func @transform_0(%arg0: i32) -> (i32, i32, i32) {
    %c0_i32 = arith.constant 0 : i32
    %c0_i32_0 = arith.constant 0 : i32
    %c0_i32_1 = arith.constant 0 : i32
    return %arg0, %c0_i32, %c0_i32_0 : i32, i32, i32
  }
  func.func @transform_1(%arg0: i32) -> (i32, i32) {
    %c0_i32 = arith.constant 0 : i32
    %c0_i32_0 = arith.constant 0 : i32
    %c0_i32_1 = arith.constant 0 : i32
    return %c0_i32, %c0_i32_0 : i32, i32
  }
  func.func @transform_2(%arg0: i32) -> (i32, i32) {
    %c0_i32 = arith.constant 0 : i32
    %c0_i32_0 = arith.constant 0 : i32
    %c0_i32_1 = arith.constant 0 : i32
    return %c0_i32, %c0_i32_0 : i32, i32
  }
  func.func @transform_3(%arg0: i32) -> (i32, i32) {
    %c0_i32 = arith.constant 0 : i32
    %c0_i32_0 = arith.constant 0 : i32
    %c0_i32_1 = arith.constant 0 : i32
    return %c0_i32, %c0_i32_0 : i32, i32
  }
  func.func @transform_4(%arg0: i32) -> (i32, i32) {
    %c0_i32 = arith.constant 0 : i32
    %c0_i32_0 = arith.constant 0 : i32
    %c0_i32_1 = arith.constant 0 : i32
    return %c0_i32, %c0_i32_0 : i32, i32
  }
  func.func @transform_5(%arg0: i32) -> (i32, i32, i32) {
    %c0_i32 = arith.constant 0 : i32
    %c0_i32_0 = arith.constant 0 : i32
    %c0_i32_1 = arith.constant 0 : i32
    return %arg0, %c0_i32, %c0_i32_0 : i32, i32, i32
  }
}

</mosaic_0001>

<bundles_post_ra>
// kernel: tpu_custom_call.1
= control target key start
LH: loop header
LB: loop body
LE: loop exit
PB: predicated region body
PF: predicated region fallthrough
CT: control target
= control target key end

     0   :  { %10 = vsyncpa [#allocation4], 0  ;;  %s1925_s0 = inlined_call_operand.hbm [shape: f32[2,16,32], index: 0, kind: input, shape index: {}]   ;;  %s1926_s1 = inlined_call_operand.hbm [shape: f32[32,96], index: 1, kind: input, shape index: {}]   ;;  %s1927_s2 = inlined_call_operand.vmem [shape: f32[1,96], index: 2, kind: input, shape index: {}]   ;;  %s1928_s3 = inlined_call_operand.hbm [shape: f32[32,32], index: 3, kind: input, shape index: {}]   ;;  %s1929_s4 = inlined_call_operand.vmem [shape: f32[1,32], index: 4, kind: input, shape index: {}]   ;;  %s1930_s5 = inlined_call_operand.hbm [shape: f32[2,16,32], index: 5, kind: output, shape index: {}]  }
   0x1   :  { %11 = vsyncpa [#allocation7], 0 }
   0x2   :  { %12 = vsyncpa [#allocation5], 0  ;;  %s30_s20 = sshll.u32 %s1926_s1, 4  ;;  %s1523_s21 = smov [#allocation6]   ;;  %s31_s20 = int_to_ptr.hbm [resolvable:$true] %s30_s20 }
   0x3   :  { %s32_s22 = sshll.u32 %s1523_s21, 4  ;;  %s17_s25 = sshll.u32 %s1925_s0, 4  ;;  %s33_s22 = int_to_ptr.vmem [resolvable:$true] %s32_s22  ;;  %s18_s25 = int_to_ptr.hbm [resolvable:$true] %s17_s25 }
   0x4   :  { %s1524_s26 = smov 128   ;;  %s1525_s27 = smov 8  }
   0x5   :  { %38 = dma.hbm_to_vmem [thread:$0]  %s31_s20, 512, %s33_s22, [#allocation7], %s1524_s26, %s1524_s26, %s1525_s27  }
   0x6   :  { %s1526_s28 = smov [#allocation3]   ;;  %s45_s1 = sshll.u32 %s1928_s3, 4  ;;  %s46_s1 = int_to_ptr.hbm [resolvable:$true] %s45_s1 }
   0x7   :  { %s19_s29 = sshll.u32 %s1526_s28, 4  ;;  %s1527_s0 = smov [#allocation8]   ;;  %s20_s29 = int_to_ptr.vmem [resolvable:$true] %s19_s29 }
   0x8   :  { %25 = dma.hbm_to_vmem [thread:$0]  %s18_s25, 512, %s20_s29, [#allocation4], %s1524_s26, %s1524_s26, %s1525_s27  }
   0x9   :  { %s47_s7 = sshll.u32 %s1527_s0, 4  ;;  %s48_s7 = int_to_ptr.vmem [resolvable:$true] %s47_s7 }
   0xa   :  { %53 = dma.hbm_to_vmem [thread:$0]  %s46_s1, 512, %s48_s7, [#allocation7], %s1524_s26, %s1524_s26, %s1525_s27  }
   0xb   :  { %1517 = dma.done.wait [#allocation4], 512  }
   0xc   :  { %1518 = vsyncadd [#allocation4], 4294966784 }
   0xd   :  { %1519 = dma.done.wait [#allocation7], 1024  }
   0xe   :  { %1520 = vsyncadd [#allocation7], 4294966272  ;;  %v75_v0 = vld [vmem:[#allocation6 + $0x18] sm:$0xff]  ;;  %v74_v1 = vld [vmem:[#allocation6 + $0x10] sm:$0xff]  ;;  %vm80_vm0 = vcmask 261120   ;;  %s1528_s9 = smov 120  }
   0xf   :  { %105 = vmatpush.msra.mxu0 %v75_v0  ;;  %v73_v2 = vld [vmem:[#allocation6 + $0x8] sm:$0xff]  ;;  %v72_v3 = vld [vmem:[#allocation6] sm:$0xff]  ;;  %s1529_s10 = smov 88   ;;  %s1530_s11 = smov 96   ;;  %v70_v15 = vld [vmem:[#allocation3 + $0x10] sm:$0xff]  ;;  %vm128_vm1 = vcmask 64512  }
  0x10   :  { %v68_v4 = vld [vmem:[#allocation3] sm:$0xff]  ;;  %v69_v5 = vld [vmem:[#allocation3 + $0x8] sm:$0xff]  ;;  %s1532_s12 = smov 80   ;;  %s1533_s13 = smov 72   ;;  %v71_v19 = vld [vmem:[#allocation3 + $0x18] sm:$0xff]  ;;  %vm160_vm2 = vcmask 130048  }
  0x11   :  { %106 = vmatpush.msra.mxu0 %v74_v1  ;;  %v1595_v6 = vld [vmem:[%s1927_s2] ss:$0 sm:$0xff]  ;;  %s1531_s2 = smov 112   ;;  %s1534_s14 = smov 64  }
  0x12   :  { %s1535_s15 = smov 104   ;;  %s1536_s16 = smov 56  }
  0x13   :  { %107 = vmatpush.msra.mxu0 %v73_v2  ;;  %s1537_s17 = smov 48   ;;  %s1538_s18 = smov 40  }
  0x14   :  { %s1539_s19 = smov 16   ;;  %s1540_s20 = smov 24  }
  0x15   :  { %108 = vmatpush.msra.mxu0 %v72_v3  ;;  %s1541_s23 = smov [#allocation9]   ;;  %s1226_s29 = sshll.u32 %s1930_s5, 4  ;;  %s1227_s29 = int_to_ptr.hbm [resolvable:$true] %s1226_s29 }
  0x16   :  { %1240 = vmatmul.msk.f32.vlgmr.msra.gmra.mxu0 %vm80_vm0, %v68_v4  ;;  %s1224_s24 = sshll.u32 %s1541_s23, 4  ;;  %s1225_s24 = int_to_ptr.vmem [resolvable:$true] %s1224_s24 }
  0x1e   :  { %1241 = vmatmul.msk.f32.gmra.mxu0 %vm80_vm0, %v69_v5 }
  0x26   :  { %1242 = vmatmul.msk.f32.gmra.mxu0 %vm80_vm0, %v70_v15 }
  0x2e   :  { %1243 = vmatmul.msk.f32.gmra.mxu0 %vm80_vm0, %v71_v19 }
  0x93   :  { %v110_v7 = vpop.f32.mrf.mxu0 }
  0x94   :  { %v111_v8 = vadd.f32 %v1595_v6, %v110_v7 }
  0x96   :  { %246 = vrot.lane.b32.xlu2 %v111_v8, %s1528_s9 }
  0x9b   :  { %v113_v9 = vpop.f32.mrf.mxu0 }
  0x9c   :  { %v114_v10 = vadd.f32 %v1595_v6, %v113_v9 }
  0x9e   :  { %252 = vrot.lane.b32.xlu1 %v114_v10, %s1529_s10  ;;  %126 = vrot.lane.b32.xlu0 %v114_v10, %s1530_s11  ;;  %v1606_v11 = vpack.i.bf16 %v111_v8, %v114_v10 }
  0x9f   :  { %248 = vrot.lane.b32.xlu2 %v114_v10, %s1528_s9 }
  0xa3   :  { %v116_v35 = vpop.f32.mrf.mxu0 }
  0xa4   :  { %v117_v42 = vadd.f32 %v1595_v6, %v116_v35 }
  0xa6   :  { %250 = vrot.lane.b32.xlu1 %v111_v8, %s1529_s10  ;;  %124 = vrot.lane.b32.xlu0 %v111_v8, %s1530_s11 }
  0xa7   :  { %379 = vrot.lane.b32.xlu2 %v111_v8, %s1531_s2 }
  0xab   :  { %v119_v39 = vpop.f32.mrf.mxu0 }
  0xac   :  { %v1641_v41 = vadd.f32 %v1595_v6, %v119_v39 }
  0xae   :  { %383 = vrot.lane.b32.xlu1 %v111_v8, %s1532_s12  ;;  %516 = vrot.lane.b32.xlu0 %v111_v8, %s1533_s13  ;;  %v1700_v5 = vpack.i.bf16 %v117_v42, %v1641_v41 }
  0xaf   :  { %1316 = vrot.lane.b32.xlu2 %v1606_v11, %s1534_s14 }
  0xb6   :  { %512 = vrot.lane.b32.xlu1 %v111_v8, %s1535_s15  ;;  %518 = vrot.lane.b32.xlu0 %v114_v10, %s1533_s13 }
  0xb7   :  { %385 = vrot.lane.b32.xlu2 %v114_v10, %s1532_s12 }
  0xbe   :  { %1321 = vrot.lane.b32.xlu1 %v1606_v11, %s1536_s16  ;;  %381 = vrot.lane.b32.xlu0 %v114_v10, %s1531_s2 }
  0xbf   :  { %514 = vrot.lane.b32.xlu2 %v114_v10, %s1535_s15 }
  0xf0   :  { %v247_v12 = vpop.permute.xlu2 %246 }
  0xf9   :  { %v249_v13 = vpop.permute.xlu2 %248 }
 0x101   :  { %v380_v14 = vpop.permute.xlu2 %379 }
 0x109   :  { %v1317_v16 = vpop.permute.xlu2 %1316 }
 0x10a   :  { %v1318_v17 = vunpack.i.l.bf16 %v1317_v16  ;;  %v1319_v18 = vunpack.i.h.bf16 %v1317_v16 }
 0x10c   :  { %205 = vmatpush.msra.mxu2 %v1318_v17 }
 0x10e   :  { %206 = vmatpush.msra.mxu2 %v1319_v18 }
 0x110   :  { %v253_v20 = vpop.permute.xlu1 %252  ;;  %v127_v21 = vpop.permute.xlu0 %126 }
 0x111   :  { %v386_v22 = vpop.permute.xlu2 %385  ;;  %1244 = vmatpush.xpose.msk.msra.mxu3 %vm128_vm1, %v127_v21 }
 0x112   :  { %1256 = vmatpush.xpose.msk.msra.mxu1 %vm128_vm1, %v386_v22 }
 0x118   :  { %v251_v23 = vpop.permute.xlu1 %250  ;;  %v125_v24 = vpop.permute.xlu0 %124 }
 0x119   :  { %1245 = vmatpush.xpose.msk.msra.mxu3 %vm128_vm1, %v125_v24  ;;  %v515_v50 = vpop.permute.xlu2 %514 }
 0x11c   :  { %1246 = vmatmul.msk.f32.vlgmr.msra.gmra.mxu3 %vm128_vm1, %v111_v8 }
 0x11d   :  { %1250 = vmatpush.xpose.msk.msrb.mxu3 %vm128_vm1, %v253_v20 }
 0x120   :  { %v384_v25 = vpop.permute.xlu1 %383  ;;  %v1627_v26 = vpop.permute.xlu0 %516 }
 0x121   :  { %1251 = vmatpush.xpose.msk.msrb.mxu3 %vm128_vm1, %v251_v23  ;;  %1257 = vmatpush.xpose.msk.msra.mxu1 %vm128_vm1, %v384_v25 }
 0x124   :  { %1247 = vmatmul.msk.f32.gmra.mxu3 %vm128_vm1, %v114_v10  ;;  %1258 = vmatmul.msk.f32.vlgmr.msra.gmra.mxu1 %vm128_vm1, %v380_v14 }
 0x128   :  { %v1632_v27 = vpop.permute.xlu1 %512  ;;  %v519_v28 = vpop.permute.xlu0 %518 }
 0x12c   :  { %1252 = vmatmul.msk.f32.vlgmr.msrb.gmra.mxu3 %vm128_vm1, %v247_v12 }
 0x130   :  { %v1322_v29 = vpop.permute.xlu1 %1321  ;;  %v382_v30 = vpop.permute.xlu0 %381 }
 0x131   :  { %1259 = vmatmul.msk.f32.gmra.mxu1 %vm128_vm1, %v382_v30  ;;  %v1323_v31 = vunpack.i.l.bf16 %v1322_v29  ;;  %v1324_v32 = vunpack.i.h.bf16 %v1322_v29 }
 0x133   :  { %329 = vmatpush.msrb.mxu2 %v1323_v31 }
 0x134   :  { %1253 = vmatmul.msk.f32.gmra.mxu3 %vm128_vm1, %v249_v13 }
 0x135   :  { %330 = vmatpush.msrb.mxu2 %v1324_v32 }
 0x19f   :  { %v154_v33 = vpop.f32.mrf.mxu3 }
 0x1a0   :  { %v161_v34 = vsel %vm160_vm2, %v154_v33, -inf }
 0x1a1   :  { %162 = vmax.xlane.f32.xlu0 %v161_v34  ;;  %v1664_v45 = vpop.f32.mrf.mxu1 }
 0x1a2   :  { %v418_v46 = vsel %vm160_vm2, %v1664_v45, -inf }
 0x1a7   :  { %v157_v36 = vpop.f32.mrf.mxu3 }
 0x1a8   :  { %v164_v37 = vsel %vm160_vm2, %v157_v36, -inf }
 0x1a9   :  { %165 = vmax.xlane.f32.xlu1 %v164_v37 }
 0x1ae   :  { %v415_v61 = vpop.f32.mrf.mxu1 }
 0x1af   :  { %v279_v38 = vpop.f32.mrf.mxu3  ;;  %v421_v0 = vsel %vm160_vm2, %v415_v61, -inf }
 0x1b0   :  { %v285_v40 = vsel %vm160_vm2, %v279_v38, -inf }
 0x1b1   :  { %286 = vmax.xlane.f32.xlu2 %v285_v40 }
 0x1b5   :  { %773 = vrot.lane.b32.xlu0 %v1641_v41, %s1529_s10 }
 0x1b7   :  { %v282_v43 = vpop.f32.mrf.mxu3 }
 0x1b8   :  { %v288_v44 = vsel %vm160_vm2, %v282_v43, -inf }
 0x1c2   :  { %649 = vrot.lane.b32.xlu1 %v1641_v41, %s1530_s11 }
 0x1c9   :  { %647 = vrot.lane.b32.xlu2 %v117_v42, %s1530_s11 }
 0x1ca   :  { %771 = vrot.lane.b32.xlu1 %v117_v42, %s1529_s10 }
 0x1d1   :  { %769 = vrot.lane.b32.xlu2 %v1641_v41, %s1528_s9 }
 0x1d2   :  { %905 = vrot.lane.b32.xlu1 %v1641_v41, %s1532_s12 }
 0x1d9   :  { %903 = vrot.lane.b32.xlu2 %v117_v42, %s1532_s12 }
 0x1da   :  { %1035 = vrot.lane.b32.xlu1 %v117_v42, %s1533_s13 }
 0x1df   :  { %289 = vmax.xlane.f32.xlu0 %v288_v44 }
 0x1e1   :  { %1031 = vrot.lane.b32.xlu2 %v117_v42, %s1535_s15 }
 0x1e2   :  { %901 = vrot.lane.b32.xlu1 %v1641_v41, %s1531_s2 }
 0x1f3   :  { %767 = vrot.lane.b32.xlu0 %v117_v42, %s1528_s9 }
 0x1fb   :  { %1037 = vrot.lane.b32.xlu0 %v1641_v41, %s1533_s13 }
 0x203   :  { %899 = vrot.lane.b32.xlu0 %v117_v42, %s1531_s2 }
 0x20a   :  { %419 = vmax.xlane.f32.xlu2 %v418_v46 }
 0x20b   :  { %1033 = vrot.lane.b32.xlu0 %v1641_v41, %s1535_s15 }
 0x214   :  { %v163_v47 = vpop.xlane.xlu0 %162 }
 0x215   :  { %v167_v48 = vsub.f32 %v154_v33, %v163_v47 }
 0x217   :  { %v169_v49 = vmul.f32 1.442695, %v167_v48 }
 0x219   :  { %1357 = vpow2.f32 %v169_v49 }
 0x21c   :  { %v166_v51 = vpop.xlane.xlu1 %165 }
 0x21d   :  { %v168_v52 = vsub.f32 %v157_v36, %v166_v51 }
 0x21f   :  { %v1670_v53 = vpop.eup %1357  ;;  %v171_v54 = vmul.f32 1.442695, %v168_v52 }
 0x220   :  { %1248 = vmatmul.msk.f32.vlgmr.msra.gmra.mxu2 %vm160_vm2, %v1670_v53 }
 0x221   :  { %1359 = vpow2.f32 %v171_v54  ;;  %1262 = vmatpush.xpose.msk.msra.mxu2 %vm128_vm1, %v519_v28 }
 0x222   :  { %1326 = vrot.lane.b32.xlu2 %v1606_v11, %s1537_s17 }
 0x224   :  { %v287_v55 = vpop.xlane.xlu2 %286 }
 0x225   :  { %v291_v56 = vsub.f32 %v279_v38, %v287_v55  ;;  %1263 = vmatpush.xpose.msk.msra.mxu2 %vm128_vm1, %v1627_v26 }
 0x227   :  { %v1679_v57 = vpop.eup %1359  ;;  %v293_v58 = vmul.f32 1.442695, %v291_v56  ;;  %v774_v60 = vpop.permute.xlu0 %773 }
 0x228   :  { %1249 = vmatmul.msk.f32.gmra.mxu2 %vm160_vm2, %v1679_v57 }
 0x229   :  { %1361 = vpow2.f32 %v293_v58 }
 0x22c   :  { %v648_v62 = vpop.permute.xlu2 %647 }
 0x22f   :  { %v1683_v59 = vpop.eup %1361 }
 0x230   :  { %1254 = vmatmul.msk.f32.vlgmr.msrb.gmra.mxu2 %vm160_vm2, %v1683_v59 }
 0x231   :  { %1274 = vmatpush.xpose.msk.msrb.mxu2 %vm128_vm1, %v774_v60 }
 0x234   :  { %v650_v63 = vpop.permute.xlu1 %649  ;;  %v770_v2 = vpop.permute.xlu2 %769 }
 0x235   :  { %1268 = vmatpush.xpose.msk.msrb.mxu1 %vm128_vm1, %v650_v63  ;;  %422 = vmax.xlane.f32.xlu0 %v421_v0 }
 0x239   :  { %1269 = vmatpush.xpose.msk.msrb.mxu1 %vm128_vm1, %v648_v62 }
 0x23c   :  { %v772_v1 = vpop.permute.xlu1 %771  ;;  %1270 = vmatmul.msk.f32.vlgmr.msrb.gmra.mxu1 %vm128_vm1, %v117_v42  ;;  %v904_v4 = vpop.permute.xlu2 %903 }
 0x23d   :  { %1275 = vmatpush.xpose.msk.msrb.mxu2 %vm128_vm1, %v772_v1 }
 0x244   :  { %v906_v3 = vpop.permute.xlu1 %905  ;;  %1271 = vmatmul.msk.f32.gmra.mxu1 %vm128_vm1, %v1641_v41  ;;  %v1032_v13 = vpop.permute.xlu2 %1031 }
 0x245   :  { %1280 = vmatpush.xpose.msk.msra.mxu1 %vm128_vm1, %v906_v3 }
 0x249   :  { %1281 = vmatpush.xpose.msk.msra.mxu1 %vm128_vm1, %v904_v4  ;;  %1331 = vrot.lane.b32.xlu0 %v1606_v11, %s1538_s18 }
 0x24c   :  { %v1036_v12 = vpop.permute.xlu1 %1035 }
 0x251   :  { %1336 = vrot.lane.b32.xlu0 %v1700_v5, %s1534_s14 }
 0x252   :  { %v290_v6 = vpop.xlane.xlu0 %289 }
 0x253   :  { %v292_v7 = vsub.f32 %v282_v43, %v290_v6 }
 0x254   :  { %v902_v15 = vpop.permute.xlu1 %901 }
 0x255   :  { %v295_v8 = vmul.f32 1.442695, %v292_v7 }
 0x257   :  { %1363 = vpow2.f32 %v295_v8 }
 0x259   :  { %1341 = vrot.lane.b32.xlu0 %v1700_v5, %s1536_s16 }
 0x25d   :  { %v1706_v9 = vpop.eup %1363 }
 0x25e   :  { %1255 = vmatmul.msk.f32.gmra.mxu2 %vm160_vm2, %v1706_v9 }
 0x265   :  { %v768_v10 = vpop.permute.xlu0 %767 }
 0x266   :  { %1264 = vmatmul.msk.f32.vlgmr.msra.gmra.mxu2 %vm128_vm1, %v1632_v27 }
 0x26d   :  { %v1038_v11 = vpop.permute.xlu0 %1037 }
 0x26e   :  { %1265 = vmatmul.msk.f32.gmra.mxu2 %vm128_vm1, %v515_v50 }
 0x26f   :  { %1286 = vmatpush.xpose.msk.msra.mxu2 %vm128_vm1, %v1038_v11 }
 0x273   :  { %1287 = vmatpush.xpose.msk.msra.mxu2 %vm128_vm1, %v1036_v12  ;;  %v300_v12 = vsel %vm160_vm2, %v1706_v9, 0.0 }
 0x275   :  { %v900_v14 = vpop.permute.xlu0 %899 }
 0x276   :  { %1276 = vmatmul.msk.f32.vlgmr.msrb.gmra.mxu2 %vm128_vm1, %v768_v10  ;;  %1282 = vmatmul.msk.f32.vlgmr.msra.gmra.mxu1 %vm128_vm1, %v900_v14 }
 0x27d   :  { %v420_v16 = vpop.xlane.xlu2 %419  ;;  %v1034_v23 = vpop.permute.xlu0 %1033 }
 0x27e   :  { %v424_v17 = vsub.f32 %v1664_v45, %v420_v16  ;;  %1277 = vmatmul.msk.f32.gmra.mxu2 %vm128_vm1, %v770_v2  ;;  %1283 = vmatmul.msk.f32.gmra.mxu1 %vm128_vm1, %v902_v15 }
 0x280   :  { %v426_v18 = vmul.f32 1.442695, %v424_v17 }
 0x282   :  { %1365 = vpow2.f32 %v426_v18 }
 0x285   :  { %v1327_v19 = vpop.permute.xlu2 %1326 }
 0x286   :  { %v1328_v20 = vunpack.i.l.bf16 %v1327_v19  ;;  %1288 = vmatmul.msk.f32.vlgmr.msra.gmra.mxu2 %vm128_vm1, %v1032_v13  ;;  %v1329_v21 = vunpack.i.h.bf16 %v1327_v19  ;;  %v173_v13 = vsel %vm160_vm2, %v1670_v53, 0.0 }
 0x288   :  { %462 = vmatpush.msra.mxu3 %v1328_v20  ;;  %v1366_v22 = vpop.eup %1365 }
 0x289   :  { %v430_v60 = vsel %vm160_vm2, %v1366_v22, 0.0 }
 0x28a   :  { %463 = vmatpush.msra.mxu3 %v1329_v21 }
 0x28b   :  { %1260 = vmatmul.msk.f32.vlgmr.msra.gmra.mxu3 %vm160_vm2, %v1366_v22 }
 0x28e   :  { %1289 = vmatmul.msk.f32.gmra.mxu2 %vm128_vm1, %v1034_v23 }
 0x2a3   :  { %v1726_v37 = vpop.f32.mrf.mxu2 }
 0x2a8   :  { %v423_v24 = vpop.xlane.xlu0 %422 }
 0x2a9   :  { %v425_v25 = vsub.f32 %v415_v61, %v423_v24 }
 0x2ab   :  { %v428_v26 = vmul.f32 1.442695, %v425_v25  ;;  %v1728_v42 = vpop.f32.mrf.mxu2 }
 0x2ad   :  { %1367 = vpow2.f32 %v428_v26 }
 0x2b3   :  { %v1368_v27 = vpop.eup %1367  ;;  %v1730_v43 = vpop.f32.mrf.mxu2 }
 0x2b4   :  { %1261 = vmatmul.msk.f32.gmra.mxu3 %vm160_vm2, %v1368_v27  ;;  %v433_v0 = vsel %vm160_vm2, %v1368_v27, 0.0 }
 0x2b9   :  { %v676_v28 = vpop.f32.mrf.mxu1 }
 0x2ba   :  { %v682_v29 = vsel %vm160_vm2, %v676_v28, -inf }
 0x2bb   :  { %683 = vmax.xlane.f32.xlu1 %v682_v29  ;;  %v1332_v30 = vpop.permute.xlu0 %1331 }
 0x2bc   :  { %v1333_v31 = vunpack.i.l.bf16 %v1332_v30  ;;  %v1334_v32 = vunpack.i.h.bf16 %v1332_v30 }
 0x2be   :  { %595 = vmatpush.msrb.mxu0 %v1333_v31 }
 0x2c0   :  { %596 = vmatpush.msrb.mxu0 %v1334_v32 }
 0x2c1   :  { %v679_v33 = vpop.f32.mrf.mxu1 }
 0x2c2   :  { %v685_v34 = vsel %vm160_vm2, %v679_v33, -inf }
 0x2c3   :  { %686 = vmax.xlane.f32.xlu2 %v685_v34  ;;  %v1337_v35 = vpop.permute.xlu0 %1336 }
 0x2c4   :  { %v1338_v36 = vunpack.i.l.bf16 %v1337_v35  ;;  %v1339_v38 = vunpack.i.h.bf16 %v1337_v35 }
 0x2c6   :  { %726 = vmatpush.msrb.mxu3 %v1338_v36 }
 0x2c8   :  { %727 = vmatpush.msrb.mxu3 %v1339_v38 }
 0x2cb   :  { %v1342_v39 = vpop.permute.xlu0 %1341 }
 0x2cc   :  { %v1343_v40 = vunpack.i.l.bf16 %v1342_v39  ;;  %v1344_v41 = vunpack.i.h.bf16 %v1342_v39 }
 0x2ce   :  { %850 = vmatpush.msra.mxu0 %v1343_v40 }
 0x2d0   :  { %851 = vmatpush.msra.mxu0 %v1344_v41 }
 0x2e1   :  { %v1732_v44 = vpop.f32.mrf.mxu2 }
 0x2e9   :  { %v545_v45 = vpop.f32.mrf.mxu2 }
 0x2ea   :  { %v551_v50 = vsel %vm160_vm2, %v545_v45, -inf }
 0x2f1   :  { %v548_v46 = vpop.f32.mrf.mxu2 }
 0x2f2   :  { %v554_v52 = vsel %vm160_vm2, %v548_v46, -inf }
 0x2f3   :  { %v932_v47 = vpop.f32.mrf.mxu1 }
 0x2f4   :  { %v938_v48 = vsel %vm160_vm2, %v932_v47, -inf }
 0x2f5   :  { %939 = vmax.xlane.f32.xlu1 %v938_v48 }
 0x2f9   :  { %v1735_v49 = vpop.f32.mrf.mxu2 }
 0x2fa   :  { %v806_v56 = vsel %vm160_vm2, %v1735_v49, -inf }
 0x2fb   :  { %v1754_v63 = vpop.f32.mrf.mxu1 }
 0x2fc   :  { %v941_v1 = vsel %vm160_vm2, %v1754_v63, -inf }
 0x2fd   :  { %552 = vmax.xlane.f32.xlu1 %v551_v50 }
 0x301   :  { %v1738_v51 = vpop.f32.mrf.mxu2 }
 0x302   :  { %v809_v62 = vsel %vm160_vm2, %v1738_v51, -inf }
 0x305   :  { %555 = vmax.xlane.f32.xlu1 %v554_v52 }
 0x309   :  { %v1741_v54 = vpop.f32.mrf.mxu2 }
 0x30a   :  { %v1070_v55 = vsel %vm160_vm2, %v1741_v54, -inf }
 0x30b   :  { %1071 = vmax.xlane.f32.xlu0 %v1070_v55 }
 0x30d   :  { %807 = vmax.xlane.f32.xlu1 %v806_v56 }
 0x311   :  { %v1747_v58 = vpop.f32.mrf.mxu2 }
 0x312   :  { %v1073_v61 = vsel %vm160_vm2, %v1747_v58, -inf }
 0x313   :  { %431 = vadd.xlane.f32.xlu0 %v430_v60  ;;  %1074 = vmax.xlane.f32.xlu2 %v1073_v61 }
 0x315   :  { %810 = vmax.xlane.f32.xlu1 %v809_v62 }
 0x31b   :  { %434 = vadd.xlane.f32.xlu0 %v433_v0 }
 0x31d   :  { %942 = vmax.xlane.f32.xlu1 %v941_v1  ;;  %v465_v1 = vpop.f32.mrf.mxu3 }
 0x32b   :  { %1351 = vrot.lane.b32.xlu2 %v1700_v5, %s1538_s18 }
 0x32e   :  { %v684_v2 = vpop.xlane.xlu1 %683 }
 0x32f   :  { %v688_v3 = vsub.f32 %v676_v28, %v684_v2 }
 0x331   :  { %v690_v4 = vmul.f32 1.442695, %v688_v3 }
 0x333   :  { %1369 = vpow2.f32 %v690_v4 }
 0x336   :  { %v687_v6 = vpop.xlane.xlu2 %686  ;;  %1346 = vrot.lane.b32.xlu1 %v1700_v5, %s1537_s17  ;;  %v297_v5 = vsel %vm160_vm2, %v1683_v59, 0.0 }
 0x337   :  { %v689_v7 = vsub.f32 %v679_v33, %v687_v6 }
 0x339   :  { %v1370_v8 = vpop.eup %1369  ;;  %v692_v10 = vmul.f32 1.442695, %v689_v7 }
 0x33a   :  { %1272 = vmatmul.msk.f32.vlgmr.msrb.gmra.mxu3 %vm160_vm2, %v1370_v8  ;;  %v694_v23 = vsel %vm160_vm2, %v1370_v8, 0.0 }
 0x33b   :  { %1371 = vpow2.f32 %v692_v10 }
 0x341   :  { %v1764_v11 = vpop.eup %1371 }
 0x342   :  { %1273 = vmatmul.msk.f32.gmra.mxu3 %vm160_vm2, %v1764_v11 }
 0x354   :  { %301 = vadd.xlane.f32.xlu2 %v300_v12  ;;  %v468_v12 = vpop.f32.mrf.mxu3 }
 0x35c   :  { %174 = vadd.xlane.f32.xlu2 %v173_v13 }
 0x360   :  { %298 = vadd.xlane.f32.xlu1 %v297_v5 }
 0x368   :  { %v940_v14 = vpop.xlane.xlu1 %939 }
 0x369   :  { %v944_v15 = vsub.f32 %v932_v47, %v940_v14 }
 0x36b   :  { %v946_v16 = vmul.f32 1.442695, %v944_v15 }
 0x36d   :  { %1373 = vpow2.f32 %v946_v16 }
 0x370   :  { %v553_v17 = vpop.xlane.xlu1 %552 }
 0x371   :  { %v557_v18 = vsub.f32 %v545_v45, %v553_v17 }
 0x373   :  { %v1774_v19 = vpop.eup %1373  ;;  %v559_v20 = vmul.f32 1.442695, %v557_v18 }
 0x374   :  { %v950_v9 = vsel %vm160_vm2, %v1774_v19, 0.0 }
 0x375   :  { %1375 = vpow2.f32 %v559_v20  ;;  %951 = vadd.xlane.f32.xlu1 %v950_v9 }
 0x378   :  { %v556_v53 = vpop.xlane.xlu1 %555 }
 0x379   :  { %v558_v21 = vsub.f32 %v548_v46, %v556_v53 }
 0x37b   :  { %v1778_v22 = vpop.eup %1375  ;;  %v561_v59 = vmul.f32 1.442695, %v558_v21 }
 0x37c   :  { %1266 = vmatmul.msk.f32.vlgmr.msrb.gmra.mxu0 %vm160_vm2, %v1778_v22  ;;  %v563_v5 = vsel %vm160_vm2, %v1778_v22, 0.0 }
 0x37d   :  { %1377 = vpow2.f32 %v561_v59  ;;  %695 = vadd.xlane.f32.xlu1 %v694_v23 }
 0x37e   :  { %v1072_v24 = vpop.xlane.xlu0 %1071 }
 0x37f   :  { %v1076_v35 = vsub.f32 %v1741_v54, %v1072_v24 }
 0x380   :  { %v808_v25 = vpop.xlane.xlu1 %807 }
 0x381   :  { %v812_v26 = vsub.f32 %v1735_v49, %v808_v25  ;;  %v1078_v40 = vmul.f32 1.442695, %v1076_v35 }
 0x383   :  { %v1784_v27 = vpop.eup %1377  ;;  %v814_v28 = vmul.f32 1.442695, %v812_v26 }
 0x384   :  { %1267 = vmatmul.msk.f32.gmra.mxu0 %vm160_vm2, %v1784_v27 }
 0x385   :  { %1379 = vpow2.f32 %v814_v28 }
 0x386   :  { %v1075_v29 = vpop.xlane.xlu2 %1074  ;;  %v1788_v30 = vpop.xlane.xlu0 %431 }
 0x387   :  { %v482_v21 = vand.u32 2147483648, %v1788_v30  ;;  %vm476_vm8 = vweird.f32 %v1788_v30  ;;  %v480_v59 = vand.u32 2147483647, %v1788_v30 }
 0x388   :  { %v811_v31 = vpop.xlane.xlu1 %810 }
 0x389   :  { %v813_v32 = vsub.f32 %v1738_v51, %v811_v31  ;;  %v1077_v51 = vsub.f32 %v1747_v58, %v1075_v29  ;;  %v176_v58 = vsel %vm160_vm2, %v1679_v57, 0.0  ;;  %v566_v57 = vsel %vm160_vm2, %v1784_v27, 0.0 }
 0x38a   :  { %v483_v24 = vor.u32 1.1754944e-38, %v482_v21  ;;  %vm481_vm10 = vcmp.eq.f32.partialorder %v480_v59, 8.507059e+37 }
 0x38b   :  { %v1791_v33 = vpop.eup %1379  ;;  %v816_v34 = vmul.f32 1.442695, %v813_v32  ;;  %v1080_v54 = vmul.f32 1.442695, %v1077_v51 }
 0x38c   :  { %1278 = vmatmul.msk.f32.vlgmr.msra.gmra.mxu0 %vm160_vm2, %v1791_v33  ;;  %v818_v15 = vsel %vm160_vm2, %v1791_v33, 0.0 }
 0x38d   :  { %1381 = vpow2.f32 %v816_v34 }
 0x38e   :  { %v1352_v36 = vpop.permute.xlu2 %1351  ;;  %v435_v38 = vpop.xlane.xlu0 %434 }
 0x38f   :  { %v1353_v39 = vunpack.i.l.bf16 %v1352_v36  ;;  %1383 = vrcp.f32 %v435_v38  ;;  %v1354_v45 = vunpack.i.h.bf16 %v1352_v36  ;;  %v496_v2 = vand.u32 2147483648, %v435_v38 }
 0x390   :  { %v943_v41 = vpop.xlane.xlu1 %942  ;;  %1385 = vpow2.f32 %v1078_v40  ;;  %vm490_vm4 = vweird.f32 %v435_v38  ;;  %v494_v3 = vand.u32 2147483647, %v435_v38 }
 0x391   :  { %v945_v46 = vsub.f32 %v1754_v63, %v943_v41  ;;  %1114 = vmatpush.msrb.mxu0 %v1353_v39  ;;  %v497_v6 = vor.u32 1.1754944e-38, %v496_v2 }
 0x392   :  { %vm495_vm6 = vcmp.eq.f32.partialorder %v494_v3, 8.507059e+37 }
 0x393   :  { %v1382_v47 = vpop.eup %1381  ;;  %v948_v48 = vmul.f32 1.442695, %v945_v46  ;;  %1115 = vmatpush.msrb.mxu0 %v1354_v45 }
 0x394   :  { %1279 = vmatmul.msk.f32.gmra.mxu0 %vm160_vm2, %v1382_v47  ;;  %v821_v49 = vsel %vm160_vm2, %v1382_v47, 0.0 }
 0x395   :  { %v1384_v50 = vpop.eup %1383  ;;  %1387 = vpow2.f32 %v948_v48  ;;  %822 = vadd.xlane.f32.xlu1 %v821_v49 }
 0x396   :  { %v486_v52 = vmul.f32 %v1384_v50, %v435_v38  ;;  %v1386_v55 = vpop.eup %1385  ;;  %1389 = vpow2.f32 %v1080_v54  ;;  %vm491_vm3 = vweird.f32 %v1384_v50 }
 0x397   :  { %vm492_vm5 = vmor %vm490_vm4, %vm491_vm3  ;;  %1391 = vrcp.f32 %v1788_v30  ;;  %v1082_v18 = vsel %vm160_vm2, %v1386_v55, 0.0 }
 0x398   :  { %v487_v56 = vsub.f32 1.0, %v486_v52 }
 0x39a   :  { %v488_v62 = vmul.f32 %v1384_v50, %v487_v56 }
 0x39b   :  { %v1388_v60 = vpop.eup %1387 }
 0x39c   :  { %1290 = vmatmul.msk.f32.vlgmr.msrb.gmra.mxu0 %vm160_vm2, %v1386_v55  ;;  %v953_v61 = vsel %vm160_vm2, %v1388_v60, 0.0  ;;  %v489_v63 = vadd.f32 %v1384_v50, %v488_v62  ;;  %v1390_v0 = vpop.eup %1389 }
 0x39d   :  { %954 = vadd.xlane.f32.xlu0 %v953_v61  ;;  %v1392_v16 = vpop.eup %1391  ;;  %v1085_v32 = vsel %vm160_vm2, %v1390_v0, 0.0 }
 0x39e   :  { %v493_v4 = vsel %vm492_vm5, %v1384_v50, %v489_v63  ;;  %v472_v17 = vmul.f32 %v1392_v16, %v1788_v30  ;;  %vm477_vm7 = vweird.f32 %v1392_v16 }
 0x39f   :  { %v498_v10 = vsel %vm495_vm6, %v497_v6, %v493_v4  ;;  %vm478_vm9 = vmor %vm476_vm8, %vm477_vm7 }
 0x3a0   :  { %v500_v14 = vmul.f32 %v498_v10, %v468_v12  ;;  %v473_v20 = vsub.f32 1.0, %v472_v17 }
 0x3a2   :  { %v474_v9 = vmul.f32 %v1392_v16, %v473_v20 }
 0x3a4   :  { %1291 = vmatmul.msk.f32.gmra.mxu0 %vm160_vm2, %v1390_v0  ;;  %v475_v53 = vadd.f32 %v1392_v16, %v474_v9 }
 0x3a5   :  { %177 = vadd.xlane.f32.xlu0 %v176_v58 }
 0x3a6   :  { %v479_v23 = vsel %vm478_vm9, %v1392_v16, %v475_v53 }
 0x3a7   :  { %v484_v27 = vsel %vm481_vm10, %v483_v24, %v479_v23 }
 0x3a8   :  { %v1347_v7 = vpop.permute.xlu1 %1346  ;;  %v499_v33 = vmul.f32 %v484_v27, %v465_v1 }
 0x3a9   :  { %v1348_v8 = vunpack.i.l.bf16 %v1347_v7  ;;  %v1349_v13 = vunpack.i.h.bf16 %v1347_v7 }
 0x3ab   :  { %982 = vmatpush.msra.mxu3 %v1348_v8 }
 0x3ad   :  { %564 = vadd.xlane.f32.xlu0 %v563_v5  ;;  %983 = vmatpush.msra.mxu3 %v1349_v13 }
 0x3ae   :  { %505 = vrot.lane.b32.xlu1 %v500_v14, %s1539_s19  ;;  %1284 = vmatmul.msk.f32.vlgmr.msra.gmra.mxu3 %vm160_vm2, %v1774_v19 }
 0x3b5   :  { %567 = vadd.xlane.f32.xlu0 %v566_v57 }
 0x3b6   :  { %1285 = vmatmul.msk.f32.gmra.mxu3 %vm160_vm2, %v1388_v60 }
 0x3bd   :  { %819 = vadd.xlane.f32.xlu0 %v818_v15  ;;  %v729_v15 = vpop.f32.mrf.mxu3 }
 0x3c5   :  { %1083 = vadd.xlane.f32.xlu0 %v1082_v18 }
 0x3c7   :  { %v1818_v19 = vpop.xlane.xlu2 %301 }
 0x3c8   :  { %1393 = vrcp.f32 %v1818_v19  ;;  %v363_v63 = vand.u32 2147483648, %v1818_v19  ;;  %vm357_vm7 = vweird.f32 %v1818_v19  ;;  %v361_v1 = vand.u32 2147483647, %v1818_v19 }
 0x3ca   :  { %v364_v58 = vor.u32 1.1754944e-38, %v363_v63  ;;  %vm362_vm9 = vcmp.eq.f32.partialorder %v361_v1, 8.507059e+37 }
 0x3ce   :  { %v1394_v25 = vpop.eup %1393 }
 0x3cf   :  { %v175_v22 = vpop.xlane.xlu2 %174  ;;  %v353_v29 = vmul.f32 %v1394_v25, %v1818_v19  ;;  %vm358_vm6 = vweird.f32 %v1394_v25 }
 0x3d0   :  { %1395 = vrcp.f32 %v175_v22  ;;  %v223_v36 = vand.u32 2147483647, %v175_v22  ;;  %v225_v38 = vand.u32 2147483648, %v175_v22  ;;  %vm219_vm12 = vweird.f32 %v175_v22  ;;  %vm359_vm8 = vmor %vm357_vm7, %vm358_vm6 }
 0x3d1   :  { %v354_v35 = vsub.f32 1.0, %v353_v29 }
 0x3d2   :  { %vm224_vm14 = vcmp.eq.f32.partialorder %v223_v36, 8.507059e+37  ;;  %v226_v47 = vor.u32 1.1754944e-38, %v225_v38  ;;  %v1850_v36 = vpop.f32.mrf.mxu3 }
 0x3d3   :  { %v299_v26 = vpop.xlane.xlu1 %298  ;;  %v355_v46 = vmul.f32 %v1394_v25, %v354_v35 }
 0x3d4   :  { %1397 = vrcp.f32 %v299_v26  ;;  %v349_v48 = vand.u32 2147483648, %v299_v26  ;;  %v347_v51 = vand.u32 2147483647, %v299_v26  ;;  %vm343_vm3 = vweird.f32 %v299_v26 }
 0x3d5   :  { %v356_v61 = vadd.f32 %v1394_v25, %v355_v46 }
 0x3d6   :  { %v1396_v28 = vpop.eup %1395  ;;  %v350_v56 = vor.u32 1.1754944e-38, %v349_v48  ;;  %vm348_vm5 = vcmp.eq.f32.partialorder %v347_v51, 8.507059e+37 }
 0x3d7   :  { %v215_v31 = vmul.f32 %v1396_v28, %v175_v22  ;;  %vm220_vm11 = vweird.f32 %v1396_v28 }
 0x3d8   :  { %1086 = vadd.xlane.f32.xlu1 %v1085_v32  ;;  %vm221_vm13 = vmor %vm219_vm12, %vm220_vm11 }
 0x3d9   :  { %v216_v34 = vsub.f32 1.0, %v215_v31  ;;  %503 = vrot.lane.b32.xlu0 %v499_v33, %s1539_s19 }
 0x3da   :  { %v1398_v30 = vpop.eup %1397 }
 0x3db   :  { %v217_v39 = vmul.f32 %v1396_v28, %v216_v34  ;;  %v339_v40 = vmul.f32 %v1398_v30, %v299_v26  ;;  %vm344_vm15 = vweird.f32 %v1398_v30 }
 0x3dc   :  { %vm345_vm4 = vmor %vm343_vm3, %vm344_vm15 }
 0x3dd   :  { %v218_v41 = vadd.f32 %v1396_v28, %v217_v39  ;;  %v340_v45 = vsub.f32 1.0, %v339_v40 }
 0x3df   :  { %v222_v49 = vsel %vm221_vm13, %v1396_v28, %v218_v41  ;;  %v341_v50 = vmul.f32 %v1398_v30, %v340_v45 }
 0x3e0   :  { %v227_v52 = vsel %vm224_vm14, %v226_v47, %v222_v49 }
 0x3e1   :  { %v342_v54 = vadd.f32 %v1398_v30, %v341_v50  ;;  %v242_v55 = vmul.f32 %v227_v52, %v1726_v37  ;;  %v360_v37 = vsel %vm359_vm8, %v1394_v25, %v356_v61 }
 0x3e2   :  { %v365_v3 = vsel %vm362_vm9, %v364_v58, %v360_v37 }
 0x3e3   :  { %v346_v60 = vsel %vm345_vm4, %v1398_v30, %v342_v54  ;;  %244 = vst.msk [vmem:[#allocation2] sm:$0xff] %vm128_vm1, %v242_v55  ;;  %v367_v4 = vmul.f32 %v365_v3, %v1732_v44  ;;  %v697_v44 = vsel %vm160_vm2, %v1764_v11, 0.0 }
 0x3e4   :  { %v351_v62 = vsel %vm348_vm5, %v350_v56, %v346_v60 }
 0x3e5   :  { %v366_v0 = vmul.f32 %v351_v62, %v1730_v43 }
 0x3e7   :  { %370 = vrot.lane.b32.xlu2 %v366_v0, %s1525_s27 }
 0x3e8   :  { %v1834_v2 = vpop.xlane.xlu1 %951 }
 0x3e9   :  { %vm996_vm5 = vweird.f32 %v1834_v2  ;;  %v1000_v47 = vand.u32 2147483647, %v1834_v2  ;;  %v1002_v48 = vand.u32 2147483648, %v1834_v2 }
 0x3eb   :  { %vm1001_vm9 = vcmp.eq.f32.partialorder %v1000_v47, 8.507059e+37  ;;  %v1003_v60 = vor.u32 1.1754944e-38, %v1002_v48 }
 0x3ef   :  { %372 = vrot.lane.b32.xlu2 %v367_v4, %s1525_s27 }
 0x3f0   :  { %v696_v6 = vpop.xlane.xlu1 %695 }
 0x3f1   :  { %1399 = vrcp.f32 %v696_v6  ;;  %v746_v10 = vand.u32 2147483648, %v696_v6  ;;  %v744_v13 = vand.u32 2147483647, %v696_v6  ;;  %vm740_vm11 = vweird.f32 %v696_v6 }
 0x3f2   :  { %1401 = vrcp.f32 %v1834_v2 }
 0x3f3   :  { %v747_v14 = vor.u32 1.1754944e-38, %v746_v10  ;;  %vm745_vm13 = vcmp.eq.f32.partialorder %v744_v13, 8.507059e+37 }
 0x3f7   :  { %v1400_v43 = vpop.eup %1399 }
 0x3f8   :  { %v736_v7 = vmul.f32 %v1400_v43, %v696_v6  ;;  %vm741_vm10 = vweird.f32 %v1400_v43  ;;  %v1402_v19 = vpop.eup %1401 }
 0x3f9   :  { %vm742_vm12 = vmor %vm740_vm11, %vm741_vm10  ;;  %v992_v9 = vmul.f32 %v1402_v19, %v1834_v2  ;;  %v598_v23 = vpop.f32.mrf.mxu0  ;;  %vm997_vm4 = vweird.f32 %v1402_v19 }
 0x3fa   :  { %v737_v8 = vsub.f32 1.0, %v736_v7  ;;  %vm1859_vm7 = vmor %vm996_vm5, %vm997_vm4 }
 0x3fb   :  { %v993_v11 = vsub.f32 1.0, %v992_v9 }
 0x3fc   :  { %v738_v12 = vmul.f32 %v1400_v43, %v737_v8 }
 0x3fd   :  { %v994_v29 = vmul.f32 %v1402_v19, %v993_v11 }
 0x3fe   :  { %v739_v5 = vadd.f32 %v1400_v43, %v738_v12 }
 0x3ff   :  { %v995_v40 = vadd.f32 %v1402_v19, %v994_v29 }
 0x400   :  { %v743_v57 = vsel %vm742_vm12, %v1400_v43, %v739_v5 }
 0x401   :  { %v748_v16 = vsel %vm745_vm13, %v747_v14, %v743_v57  ;;  %v601_v45 = vpop.f32.mrf.mxu0 }
 0x402   :  { %v763_v17 = vmul.f32 %v748_v16, %v729_v15 }
 0x403   :  { %698 = vadd.xlane.f32.xlu0 %v697_v44 }
 0x404   :  { %765 = vst.msk [vmem:[#allocation2 + $0x10] sm:$0xff] %vm128_vm1, %v763_v17 }
 0x408   :  { %v1845_v21 = vpop.xlane.xlu1 %822 }
 0x409   :  { %v853_v10 = vpop.f32.mrf.mxu0  ;;  %v884_v44 = vand.u32 2147483648, %v1845_v21 }
 0x410   :  { %v1841_v18 = vpop.xlane.xlu0 %954 }
 0x418   :  { %v178_v20 = vpop.xlane.xlu0 %177 }
 0x419   :  { %1403 = vrcp.f32 %v178_v20  ;;  %v239_v25 = vand.u32 2147483648, %v178_v20  ;;  %v237_v27 = vand.u32 2147483647, %v178_v20  ;;  %vm233_vm14 = vweird.f32 %v178_v20 }
 0x41b   :  { %v240_v32 = vor.u32 1.1754944e-38, %v239_v25  ;;  %vm238_vm3 = vcmp.eq.f32.partialorder %v237_v27, 8.507059e+37  ;;  %v856_v27 = vpop.f32.mrf.mxu0 }
 0x41f   :  { %v1404_v53 = vpop.eup %1403 }
 0x420   :  { %v229_v22 = vmul.f32 %v1404_v53, %v178_v20  ;;  %v565_v59 = vpop.xlane.xlu0 %564  ;;  %vm234_vm2 = vweird.f32 %v1404_v53  ;;  %v882_v20 = vand.u32 2147483647, %v1845_v21 }
 0x421   :  { %1405 = vrcp.f32 %v565_v59  ;;  %vm235_vm15 = vmor %vm233_vm14, %vm234_vm2  ;;  %v615_v46 = vand.u32 2147483648, %v565_v59  ;;  %v613_v51 = vand.u32 2147483647, %v565_v59  ;;  %vm609_vm8 = vweird.f32 %v565_v59 }
 0x422   :  { %v230_v24 = vsub.f32 1.0, %v229_v22  ;;  %1407 = vrcp.f32 %v1845_v21 }
 0x423   :  { %v616_v56 = vor.u32 1.1754944e-38, %v615_v46  ;;  %vm614_vm11 = vcmp.eq.f32.partialorder %v613_v51, 8.507059e+37  ;;  %v1117_v51 = vpop.f32.mrf.mxu0 }
 0x424   :  { %v231_v26 = vmul.f32 %v1404_v53, %v230_v24  ;;  %v885_v24 = vor.u32 1.1754944e-38, %v884_v44 }
 0x426   :  { %v232_v28 = vadd.f32 %v1404_v53, %v231_v26 }
 0x427   :  { %v1406_v31 = vpop.eup %1405 }
 0x428   :  { %v236_v33 = vsel %vm235_vm15, %v1404_v53, %v232_v28  ;;  %v605_v34 = vmul.f32 %v1406_v31, %v565_v59  ;;  %v568_v30 = vpop.xlane.xlu0 %567  ;;  %v1848_v35 = vpop.eup %1407  ;;  %vm610_vm6 = vweird.f32 %v1406_v31 }
 0x429   :  { %v241_v38 = vsel %vm238_vm3, %v240_v32, %v236_v33  ;;  %1409 = vrcp.f32 %v568_v30  ;;  %v874_v49 = vmul.f32 %v1848_v35, %v1845_v21  ;;  %vm611_vm10 = vmor %vm609_vm8, %vm610_vm6  ;;  %v629_v6 = vand.u32 2147483648, %v568_v30 }
 0x42a   :  { %v606_v39 = vsub.f32 1.0, %v605_v34  ;;  %v243_v41 = vmul.f32 %v241_v38, %v1728_v42  ;;  %v999_v42 = vsel %vm1859_vm7, %v1402_v19, %v995_v40  ;;  %v627_v8 = vand.u32 2147483647, %v568_v30  ;;  %v506_v40 = vpop.permute.xlu1 %505 }
 0x42b   :  { %v875_v61 = vsub.f32 1.0, %v874_v49  ;;  %v1004_v37 = vsel %vm1001_vm9, %v1003_v60, %v999_v42  ;;  %vm623_vm13 = vweird.f32 %v568_v30  ;;  %vm879_vm2 = vweird.f32 %v1848_v35 }
 0x42c   :  { %v607_v50 = vmul.f32 %v1406_v31, %v606_v39  ;;  %245 = vst.msk [vmem:[#allocation2 + $0x8] sm:$0xff] %vm128_vm1, %v243_v41  ;;  %v630_v5 = vor.u32 1.1754944e-38, %v629_v6  ;;  %vm628_vm15 = vcmp.eq.f32.partialorder %v627_v8, 8.507059e+37  ;;  %vm878_vm3 = vweird.f32 %v1845_v21 }
 0x42d   :  { %v876_v43 = vmul.f32 %v1848_v35, %v875_v61  ;;  %vm880_vm4 = vmor %vm878_vm3, %vm879_vm2  ;;  %vm883_vm6 = vcmp.eq.f32.partialorder %v882_v20, 8.507059e+37  ;;  %vm376_vm8 = vcmask 130112   ;;  %vm509_vm2 = vcmask 195712  }
 0x42e   :  { %v608_v54 = vadd.f32 %v1406_v31, %v607_v50  ;;  %vm1010_vm3 = vweird.f32 %v1841_v18 }
 0x42f   :  { %v1410_v55 = vpop.eup %1409  ;;  %v877_v14 = vadd.f32 %v1848_v35, %v876_v43 }
 0x430   :  { %v619_v62 = vmul.f32 %v1410_v55, %v568_v30  ;;  %v820_v63 = vpop.xlane.xlu0 %819  ;;  %v612_v0 = vsel %vm611_vm10, %v1406_v31, %v608_v54  ;;  %vm624_vm12 = vweird.f32 %v1410_v55 }
 0x431   :  { %1411 = vrcp.f32 %v820_v63  ;;  %v985_v1 = vpop.f32.mrf.mxu3  ;;  %v617_v2 = vsel %vm614_vm11, %v616_v56, %v612_v0  ;;  %vm625_vm14 = vmor %vm623_vm13, %vm624_vm12  ;;  %v870_v22 = vand.u32 2147483648, %v820_v63  ;;  %v881_v59 = vsel %vm880_vm4, %v1848_v35, %v877_v14 }
 0x432   :  { %v620_v58 = vsub.f32 1.0, %v619_v62  ;;  %v1019_v3 = vmul.f32 %v1004_v37, %v985_v1  ;;  %v632_v4 = vmul.f32 %v617_v2, %v598_v23  ;;  %1413 = vrcp.f32 %v1841_v18 }
 0x433   :  { %v868_v11 = vand.u32 2147483647, %v820_v63  ;;  %vm864_vm7 = vweird.f32 %v820_v63  ;;  %v886_v28 = vsel %vm883_vm6, %v885_v24, %v881_v59  ;;  %v871_v29 = vor.u32 1.1754944e-38, %v870_v22  ;;  %v1170_v59 = vld [vmem:[#allocation8 + $0x18] sm:$0xff]  ;;  %v1168_v24 = vld [vmem:[#allocation8 + $0x8] sm:$0xff] }
 0x434   :  { %v621_v7 = vmul.f32 %v1410_v55, %v620_v58  ;;  %1023 = vrot.lane.b32.xlu2 %v1019_v3, %s1539_s19  ;;  %636 = vrot.lane.b32.xlu1 %v632_v4, %s1540_s20  ;;  %v888_v35 = vmul.f32 %v886_v28, %v856_v27  ;;  %v1016_v56 = vand.u32 2147483648, %v1841_v18  ;;  %v1014_v62 = vand.u32 2147483647, %v1841_v18 }
 0x435   :  { %vm869_vm10 = vcmp.eq.f32.partialorder %v868_v11, 8.507059e+37  ;;  %1199 = vmatpush.msrb.mxu1 %v1170_v59 }
 0x436   :  { %v622_v12 = vadd.f32 %v1410_v55, %v621_v7  ;;  %v1017_v1 = vor.u32 1.1754944e-38, %v1016_v56 }
 0x437   :  { %v1412_v13 = vpop.eup %1411 }
 0x438   :  { %v860_v57 = vmul.f32 %v1412_v13, %v820_v63  ;;  %v1084_v15 = vpop.xlane.xlu0 %1083  ;;  %v626_v16 = vsel %vm625_vm14, %v1410_v55, %v622_v12  ;;  %v1874_v53 = vpop.eup %1413  ;;  %vm865_vm5 = vweird.f32 %v1412_v13 }
 0x439   :  { %1415 = vrcp.f32 %v1084_v15  ;;  %v631_v17 = vsel %vm628_vm15, %v630_v5, %v626_v16  ;;  %v1006_v25 = vmul.f32 %v1874_v53, %v1841_v18  ;;  %vm866_vm9 = vmor %vm864_vm7, %vm865_vm5  ;;  %v1134_v41 = vand.u32 2147483648, %v1084_v15  ;;  %v988_v0 = vpop.f32.mrf.mxu3  ;;  %v1120_v12 = vpop.f32.mrf.mxu0 }
 0x43a   :  { %v861_v19 = vsub.f32 1.0, %v860_v57  ;;  %v633_v9 = vmul.f32 %v631_v17, %v601_v45  ;;  %v1132_v46 = vand.u32 2147483647, %v1084_v15  ;;  %vm1128_vm12 = vweird.f32 %v1084_v15 }
 0x43b   :  { %v1007_v30 = vsub.f32 1.0, %v1006_v25  ;;  %v1135_v49 = vor.u32 1.1754944e-38, %v1134_v41  ;;  %vm1011_vm15 = vweird.f32 %v1874_v53  ;;  %vm1015_vm5 = vcmp.eq.f32.partialorder %v1014_v62, 8.507059e+37  ;;  %v1167_v25 = vld [vmem:[#allocation8] sm:$0xff] }
 0x43c   :  { %v862_v23 = vmul.f32 %v1412_v13, %v861_v19  ;;  %638 = vrot.lane.b32.xlu2 %v633_v9, %s1540_s20  ;;  %vm1133_vm14 = vcmp.eq.f32.partialorder %v1132_v46, 8.507059e+37  ;;  %vm1012_vm4 = vmor %vm1010_vm3, %vm1011_vm15  ;;  %vm642_vm15 = vcmask 261312  }
 0x43d   :  { %v1008_v47 = vmul.f32 %v1874_v53, %v1007_v30 }
 0x43e   :  { %v863_v21 = vadd.f32 %v1412_v13, %v862_v23  ;;  %v1169_v23 = vld [vmem:[#allocation8 + $0x10] sm:$0xff] }
 0x43f   :  { %v1416_v26 = vpop.eup %1415  ;;  %v1009_v54 = vadd.f32 %v1874_v53, %v1008_v47  ;;  %1200 = vmatpush.msrb.mxu1 %v1169_v23 }
 0x440   :  { %v1124_v31 = vmul.f32 %v1416_v26, %v1084_v15  ;;  %v867_v32 = vsel %vm866_vm9, %v1412_v13, %v863_v21  ;;  %vm1129_vm11 = vweird.f32 %v1416_v26 }
 0x441   :  { %v371_v33 = vpop.permute.xlu2 %370  ;;  %v872_v34 = vsel %vm869_vm10, %v871_v29, %v867_v32  ;;  %vm1130_vm13 = vmor %vm1128_vm12, %vm1129_vm11  ;;  %v1013_v63 = vsel %vm1012_vm4, %v1874_v53, %v1009_v54  ;;  %1201 = vmatpush.msrb.mxu1 %v1168_v24 }
 0x442   :  { %v1125_v38 = vsub.f32 1.0, %v1124_v31  ;;  %377 = vst.msk [vmem:[#allocation2] sm:$0xff] %vm376_vm8, %v371_v33  ;;  %v887_v39 = vmul.f32 %v872_v34, %v853_v10  ;;  %v1018_v37 = vsel %vm1015_vm5, %v1017_v1, %v1013_v63 }
 0x443   :  { %v1020_v58 = vmul.f32 %v1018_v37, %v988_v0  ;;  %1202 = vmatpush.msrb.mxu1 %v1167_v25 }
 0x444   :  { %v1126_v45 = vmul.f32 %v1416_v26, %v1125_v38  ;;  %891 = vrot.lane.b32.xlu1 %v887_v39, %s1525_s27  ;;  %893 = vrot.lane.b32.xlu2 %v888_v35, %s1525_s27  ;;  %v1356_v38 = vld [vmem:[%s1929_s4] ss:$0 sm:$0xff] }
 0x446   :  { %v1127_v48 = vadd.f32 %v1416_v26, %v1126_v45 }
 0x448   :  { %v1131_v50 = vsel %vm1130_vm13, %v1416_v26, %v1127_v48 }
 0x449   :  { %v373_v52 = vpop.permute.xlu2 %372  ;;  %v1136_v42 = vsel %vm1133_vm14, %v1135_v49, %v1131_v50 }
 0x44a   :  { %378 = vst.msk [vmem:[#allocation2 + $0x8] sm:$0xff] %vm376_vm8, %v373_v52  ;;  %v1151_v55 = vmul.f32 %v1136_v42, %v1117_v51 }
 0x44b   :  { %v1087_v60 = vpop.xlane.xlu1 %1086  ;;  %v504_v61 = vpop.permute.xlu0 %503  ;;  %511 = vst.msk [vmem:[#allocation2 + $0x8] sm:$0xff] %vm509_vm2, %v506_v40 }
 0x44c   :  { %1417 = vrcp.f32 %v1087_v60  ;;  %510 = vst.msk [vmem:[#allocation2] sm:$0xff] %vm509_vm2, %v504_v61  ;;  %1155 = vrot.lane.b32.xlu1 %v1151_v55, %s1540_s20  ;;  %v1148_v6 = vand.u32 2147483648, %v1087_v60  ;;  %v1146_v43 = vand.u32 2147483647, %v1087_v60  ;;  %vm1142_vm7 = vweird.f32 %v1087_v60 }
 0x44e   :  { %v1149_v8 = vor.u32 1.1754944e-38, %v1148_v6  ;;  %vm1147_vm10 = vcmp.eq.f32.partialorder %v1146_v43, 8.507059e+37 }
 0x452   :  { %v1418_v2 = vpop.eup %1417 }
 0x453   :  { %v1138_v3 = vmul.f32 %v1418_v2, %v1087_v60  ;;  %vm1143_vm6 = vweird.f32 %v1418_v2 }
 0x454   :  { %1025 = vrot.lane.b32.xlu1 %v1020_v58, %s1539_s19  ;;  %vm1144_vm9 = vmor %vm1142_vm7, %vm1143_vm6 }
 0x455   :  { %v1139_v4 = vsub.f32 1.0, %v1138_v3 }
 0x457   :  { %v1140_v18 = vmul.f32 %v1418_v2, %v1139_v4 }
 0x459   :  { %v1141_v7 = vadd.f32 %v1418_v2, %v1140_v18 }
 0x45b   :  { %v1145_v10 = vsel %vm1144_vm9, %v1418_v2, %v1141_v7 }
 0x45c   :  { %v1150_v13 = vsel %vm1147_vm10, %v1149_v8, %v1145_v10 }
 0x45d   :  { %v1152_v5 = vmul.f32 %v1150_v13, %v1120_v12 }
 0x45f   :  { %1157 = vrot.lane.b32.xlu2 %v1152_v5, %s1540_s20 }
 0x476   :  { %v699_v14 = vpop.xlane.xlu0 %698 }
 0x477   :  { %1419 = vrcp.f32 %v699_v14  ;;  %v760_v44 = vand.u32 2147483648, %v699_v14  ;;  %v758_v20 = vand.u32 2147483647, %v699_v14  ;;  %vm754_vm12 = vweird.f32 %v699_v14 }
 0x479   :  { %v761_v9 = vor.u32 1.1754944e-38, %v760_v44  ;;  %vm759_vm14 = vcmp.eq.f32.partialorder %v758_v20, 8.507059e+37 }
 0x47d   :  { %v1420_v57 = vpop.eup %1419 }
 0x47e   :  { %v750_v15 = vmul.f32 %v1420_v57, %v699_v14  ;;  %vm755_vm11 = vweird.f32 %v1420_v57 }
 0x47f   :  { %vm756_vm13 = vmor %vm754_vm12, %vm755_vm11 }
 0x480   :  { %v751_v16 = vsub.f32 1.0, %v750_v15 }
 0x482   :  { %v752_v17 = vmul.f32 %v1420_v57, %v751_v16 }
 0x484   :  { %v753_v19 = vadd.f32 %v1420_v57, %v752_v17 }
 0x486   :  { %v757_v53 = vsel %vm756_vm13, %v1420_v57, %v753_v19 }
 0x487   :  { %v762_v22 = vsel %vm759_vm14, %v761_v9, %v757_v53 }
 0x488   :  { %v764_v11 = vmul.f32 %v762_v22, %v1850_v36 }
 0x48a   :  { %766 = vst.msk [vmem:[#allocation2 + $0x18] sm:$0xff] %vm128_vm1, %v764_v11 }
 0x48e   :  { %v1024_v21 = vpop.permute.xlu2 %1023 }
 0x496   :  { %v639_v26 = vpop.permute.xlu2 %638 }
 0x497   :  { %644 = vst.msk [vmem:[#allocation2 + $0x8] sm:$0xff] %vm642_vm15, %v639_v26 }
 0x49e   :  { %v894_v27 = vpop.permute.xlu2 %893  ;;  %v1164_v31 = vld [vmem:[#allocation2 + $0x8] sm:$0xff] }
 0x49f   :  { %898 = vst.msk [vmem:[#allocation2 + $0x18] sm:$0xff] %vm376_vm8, %v894_v27 }
 0x4a6   :  { %v637_v28 = vpop.permute.xlu1 %636 }
 0x4a7   :  { %643 = vst.msk [vmem:[#allocation2] sm:$0xff] %vm642_vm15, %v637_v28 }
 0x4ae   :  { %v1163_v36 = vld [vmem:[#allocation2] sm:$0xff] }
 0x4af   :  { %1292 = vmatmul.msk.f32.vlgmr.msrb.gmra.mxu1 %vm80_vm0, %v1163_v36 }
 0x4b6   :  { %v892_v29 = vpop.permute.xlu1 %891 }
 0x4b7   :  { %897 = vst.msk [vmem:[#allocation2 + $0x10] sm:$0xff] %vm376_vm8, %v892_v29  ;;  %1293 = vmatmul.msk.f32.gmra.mxu1 %vm80_vm0, %v1164_v31 }
 0x4b8   :  { %1029 = vst.msk [vmem:[#allocation2 + $0x10] sm:$0xff] %vm509_vm2, %v1024_v21 }
 0x4b9   :  { %v1158_v30 = vpop.permute.xlu2 %1157 }
 0x4be   :  { %v1156_v32 = vpop.permute.xlu1 %1155 }
 0x4bf   :  { %1161 = vst.msk [vmem:[#allocation2 + $0x10] sm:$0xff] %vm642_vm15, %v1156_v32 }
 0x4c6   :  { %v1026_v33 = vpop.permute.xlu1 %1025  ;;  %v1165_v34 = vld [vmem:[#allocation2 + $0x10] sm:$0xff] }
 0x4c7   :  { %1030 = vst.msk [vmem:[#allocation2 + $0x18] sm:$0xff] %vm509_vm2, %v1026_v33  ;;  %1294 = vmatmul.msk.f32.gmra.mxu1 %vm80_vm0, %v1165_v34 }
 0x4c8   :  { %1162 = vst.msk [vmem:[#allocation2 + $0x18] sm:$0xff] %vm642_vm15, %v1158_v30 }
 0x4cf   :  { %v1166_v35 = vld [vmem:[#allocation2 + $0x18] sm:$0xff] }
 0x4d0   :  { %1295 = vmatmul.msk.f32.gmra.mxu1 %vm80_vm0, %v1166_v35 }
 0x52c   :  { %v1204_v39 = vpop.f32.mrf.mxu1 }
 0x52d   :  { %v1205_v40 = vadd.f32 %v1356_v38, %v1204_v39 }
 0x52f   :  { %1216 = vst.msk [vmem:[#allocation9] sm:$0xff] %vm80_vm0, %v1205_v40 }
 0x534   :  { %v1207_v41 = vpop.f32.mrf.mxu1 }
 0x535   :  { %v1208_v45 = vadd.f32 %v1356_v38, %v1207_v41 }
 0x537   :  { %1217 = vst.msk [vmem:[#allocation9 + $0x8] sm:$0xff] %vm80_vm0, %v1208_v45 }
 0x544   :  { %v1210_v46 = vpop.f32.mrf.mxu1 }
 0x545   :  { %v1211_v47 = vadd.f32 %v1356_v38, %v1210_v46 }
 0x547   :  { %1218 = vst.msk [vmem:[#allocation9 + $0x10] sm:$0xff] %vm80_vm0, %v1211_v47 }
 0x54d   :  { %v1213_v48 = vpop.f32.mrf.mxu1 }
 0x54e   :  { %v1214_v49 = vadd.f32 %v1356_v38, %v1213_v48 }
 0x550   :  { %1219 = vst.msk [vmem:[#allocation9 + $0x18] sm:$0xff] %vm80_vm0, %v1214_v49 }
 0x551   :  { %1232 = dma.vmem_to_hbm [thread:$0]  %s1225_s24, 512, %s1227_s29, [#allocation5], %s1524_s26, %s1524_s26, %s1525_s27  }
 0x552   :  { %1521 = dma.done.wait [#allocation5], 512  }
 0x553   :  { %1522 = vsyncadd [#allocation5], 4294966784 }
 0x554   :  { %1237 = vsyncpa [#allocation4], 1 }
 0x555   :  { %1238 = vsyncpa [#allocation7], 1 }
 0x556   :  { %1239 = vsyncpa [#allocation5], 1 }

</bundles_post_ra>
